<compile_context>
chip_gen: v7x
topology: tpu7x:2x2x1
jax: 0.10.0
libtpu: 0.0.40
codegen_flags: <defaults>
</compile_context>

<pallas_src>
import functools

import jax
import jax.numpy as jnp
from jax.experimental import pallas as pl
from jax.experimental.pallas import tpu as pltpu

SQRT_2_OVER_PI = 0.7978845608028654  # sqrt(2 / pi)


def _gelu_tanh(x):
    # exact match to the module's activation_function for activation == 'gelu'
    return 0.5 * x * (1.0 + jnp.tanh(SQRT_2_OVER_PI * (x + 0.044715 * x * x * x)))


def mlp_kernel(x_ref, mask_ref, w_in_ref, b_in_ref, w_h_ref, b_h_ref,
               w_out_ref, b_out_ref, o_ref, *, n_layers, use_dropout):
    # hidden layer 0 (index 0 < 2 -> no dropout)
    h = _gelu_tanh(
        jnp.dot(x_ref[...], w_in_ref[...], preferred_element_type=jnp.float32)
        + b_in_ref[...])

    # hidden layers 1 .. n_layers-1
    for li in range(1, n_layers):
        h = _gelu_tanh(
            jnp.dot(h, w_h_ref[li - 1], preferred_element_type=jnp.float32)
            + b_h_ref[li - 1])
        if use_dropout and li >= 2:
            # mask is already Bernoulli(keep=1-p) / (1-p): one VPU mul
            h = h * mask_ref[li - 2]

    # output head: w_out is zero-padded to 128 lanes -> lane-dense store
    logits = (jnp.dot(h, w_out_ref[...], preferred_element_type=jnp.float32)
              + b_out_ref[...])
    o_ref[...] = jax.nn.sigmoid(logits).astype(o_ref.dtype)


def binary_classification_forward(x, params, *, n_layers, p_drop,
                                  mc_simulations, key):
    """Runs mc_simulations MC-dropout forward passes in a single Pallas kernel.

    Returns probabilities of shape (mc_simulations, batch, n_outputs); each
    slice along axis 0 matches one call of the PyTorch module's forward().
    """
    batch, n_inputs = x.shape
    n_hidden = params["w_in"].shape[1]
    n_outputs = params["w_out"].shape[1]
    t = max(int(mc_simulations), 1)

    tm = 128                                   # row tile (fills an MXU pass)
    m = t * batch
    m_pad = ((m + tm - 1) // tm) * tm
    n_pad = ((n_outputs + 127) // 128) * 128   # lane-dense output width

    # Stack MC samples along M (same x, different dropout masks per sample).
    x_all = jnp.broadcast_to(x[None], (t, batch, n_inputs)).reshape(m, n_inputs)
    x_all = jnp.pad(x_all, ((0, m_pad - m), (0, 0)))

    n_drop = max(n_layers - 2, 0)
    use_dropout = (n_drop > 0) and (p_drop > 0.0)
    if use_dropout:
        keep = jax.random.bernoulli(key, 1.0 - p_drop, (n_drop, m_pad, n_hidden))
        masks = keep.astype(jnp.float32) * jnp.float32(1.0 / (1.0 - p_drop))
    else:
        masks = jnp.ones((1, m_pad, n_hidden), jnp.float32)
    mask_depth = masks.shape[0]

    # Zero-pad the head to 128 output lanes (extra columns sliced off below).
    w_out = jnp.pad(params["w_out"], ((0, 0), (0, n_pad - n_outputs)))
    b_out = jnp.pad(params["b_out"], ((0, 0), (0, n_pad - n_outputs)))

    n_h_stack = params["w_h"].shape[0]
    kernel = functools.partial(mlp_kernel, n_layers=n_layers,
                               use_dropout=use_dropout)

    out_full = pl.pallas_call(
        kernel,
        out_shape=jax.ShapeDtypeStruct((m_pad, n_pad), jnp.float32),
        grid=(m_pad // tm,),
        in_specs=[
            # activations / masks: tiled along the stacked-batch axis
            pl.BlockSpec((tm, n_inputs), lambda i: (i, 0)),
            pl.BlockSpec((mask_depth, tm, n_hidden), lambda i: (0, i, 0)),
            # weights / biases: constant index_map -> resident in VMEM
            pl.BlockSpec((n_inputs, n_hidden), lambda i: (0, 0)),
            pl.BlockSpec((1, n_hidden), lambda i: (0, 0)),
            pl.BlockSpec((n_h_stack, n_hidden, n_hidden), lambda i: (0, 0, 0)),
            pl.BlockSpec((n_h_stack, 1, n_hidden), lambda i: (0, 0, 0)),
            pl.BlockSpec((n_hidden, n_pad), lambda i: (0, 0)),
            pl.BlockSpec((1, n_pad), lambda i: (0, 0)),
        ],
        out_specs=pl.BlockSpec((tm, n_pad), lambda i: (i, 0)),
        compiler_params=pltpu.CompilerParams(
            dimension_semantics=("parallel",)),
    )(x_all, masks,
      params["w_in"], params["b_in"],
      params["w_h"], params["b_h"],
      w_out, b_out)

    return out_full[:m, :n_outputs].reshape(t, batch, n_outputs)


def init_params(key, n_inputs, n_hidden, n_layers, n_outputs):
    """Deterministic synthetic init (biases zero, Glorot-uniform weights).
    Weights are stored (in, out), i.e. pre-transposed vs. torch Linear."""
    k_in, k_h, k_out = jax.random.split(key, 3)

    def glorot(k, fan_in, fan_out):
        limit = (6.0 / (fan_in + fan_out)) ** 0.5
        return jax.random.uniform(k, (fan_in, fan_out), jnp.float32,
                                  minval=-limit, maxval=limit)

    w_in = glorot(k_in, n_inputs, n_hidden)
    b_in = jnp.zeros((1, n_hidden), jnp.float32)

    if n_layers > 1:
        keys_h = jax.random.split(k_h, n_layers - 1)
        w_h = jnp.stack([glorot(keys_h[i], n_hidden, n_hidden)
                         for i in range(n_layers - 1)], axis=0)
        b_h = jnp.zeros((n_layers - 1, 1, n_hidden), jnp.float32)
    else:
        # dummy (never read by the kernel when n_layers == 1)
        w_h = jnp.zeros((1, n_hidden, n_hidden), jnp.float32)
        b_h = jnp.zeros((1, 1, n_hidden), jnp.float32)

    w_out = glorot(k_out, n_hidden, n_outputs)
    b_out = jnp.zeros((1, n_outputs), jnp.float32)

    return dict(w_in=w_in, b_in=b_in, w_h=w_h, b_h=b_h,
                w_out=w_out, b_out=b_out)


if __name__ == "__main__":
    # Small shapes consistent with the module's forward.
    batch = 8
    n_inputs = 16
    n_hidden = 32
    n_layers = 4          # 1 input layer + 3 hidden-to-hidden layers
    n_outputs = 1
    mc_dropout = 0.1
    mc_simulations = 16   # folded into one kernel call -> M = 128 rows / dot

    root = jax.random.PRNGKey(0)
    k_x, k_p, k_d = jax.random.split(root, 3)

    x = jax.random.normal(k_x, (batch, n_inputs), dtype=jnp.float32)
    params = init_params(k_p, n_inputs, n_hidden, n_layers, n_outputs)

    out = binary_classification_forward(
        x, params, n_layers=n_layers, p_drop=mc_dropout,
        mc_simulations=mc_simulations, key=k_d)
    out = jax.block_until_ready(out)

    assert out.shape == (mc_simulations, batch, n_outputs)
    assert bool(jnp.all(jnp.isfinite(out)))
    assert bool(jnp.all((out >= 0.0) & (out <= 1.0)))
    print("KERNEL_OK")
</pallas_src>

<mosaic_0001>
module attributes {stable_mosaic.version = 11 : i64} {
  func.func @mlp_kernel(%arg0: i32, %arg1: memref<128x16xf32, #tpu.memory_space<vmem>>, %arg2: memref<2x128x32xf32, #tpu.memory_space<vmem>>, %arg3: memref<16x32xf32, #tpu.memory_space<vmem>>, %arg4: memref<1x32xf32, #tpu.memory_space<vmem>>, %arg5: memref<3x32x32xf32, #tpu.memory_space<vmem>>, %arg6: memref<3x1x32xf32, #tpu.memory_space<vmem>>, %arg7: memref<32x128xf32, #tpu.memory_space<vmem>>, %arg8: memref<1x128xf32, #tpu.memory_space<vmem>>, %arg9: memref<128x128xf32, #tpu.memory_space<vmem>>) attributes {dimension_semantics = [#tpu.dimension_semantics<parallel>], iteration_bounds = array<i64: 1>, scalar_prefetch = 0 : i64, scratch_operands = 0 : i64, tpu.core_type = #tpu.core_type<tc>, window_params = [{transform_indices = @transform_0, window_bounds = array<i64: 128, 16>}, {transform_indices = @transform_1, window_bounds = array<i64: 2, 128, 32>}, {pipeline_mode = #tpu.pipeline_mode<synchronous>, transform_indices = @transform_2, window_bounds = array<i64: 16, 32>}, {pipeline_mode = #tpu.pipeline_mode<synchronous>, transform_indices = @transform_3, window_bounds = array<i64: 1, 32>}, {pipeline_mode = #tpu.pipeline_mode<synchronous>, transform_indices = @transform_4, window_bounds = array<i64: 3, 32, 32>}, {pipeline_mode = #tpu.pipeline_mode<synchronous>, transform_indices = @transform_5, window_bounds = array<i64: 3, 1, 32>}, {pipeline_mode = #tpu.pipeline_mode<synchronous>, transform_indices = @transform_6, window_bounds = array<i64: 32, 128>}, {pipeline_mode = #tpu.pipeline_mode<synchronous>, transform_indices = @transform_7, window_bounds = array<i64: 1, 128>}, {transform_indices = @transform_8, window_bounds = array<i64: 128, 128>}]} {
    %c0 = arith.constant 0 : index
    %c0_0 = arith.constant 0 : index
    %0 = vector.load %arg1[%c0, %c0_0] : memref<128x16xf32, #tpu.memory_space<vmem>>, vector<128x16xf32>
    %c0_1 = arith.constant 0 : index
    %c0_2 = arith.constant 0 : index
    %1 = vector.load %arg3[%c0_1, %c0_2] : memref<16x32xf32, #tpu.memory_space<vmem>>, vector<16x32xf32>
    %cst = arith.constant dense<0.000000e+00> : vector<128x32xf32>
    %2 = tpu.matmul %0, %1, %cst {dimension_numbers = #tpu.dot_dimension_numbers<[1], [0], [0], [1], [0, 0, 1, 1], [], []>} : vector<128x16xf32>, vector<16x32xf32>, vector<128x32xf32> -> vector<128x32xf32>
    %c0_3 = arith.constant 0 : index
    %c0_4 = arith.constant 0 : index
    %3 = vector.load %arg4[%c0_3, %c0_4] : memref<1x32xf32, #tpu.memory_space<vmem>>, vector<1x32xf32>
    %4 = vector.broadcast %3 : vector<1x32xf32> to vector<128x32xf32>
    %5 = arith.addf %2, %4 : vector<128x32xf32>
    %cst_5 = arith.constant 5.000000e-01 : f32
    %6 = vector.broadcast %cst_5 : f32 to vector<128x32xf32>
    %7 = arith.mulf %6, %5 : vector<128x32xf32>
    %cst_6 = arith.constant 4.471500e-02 : f32
    %8 = vector.broadcast %cst_6 : f32 to vector<128x32xf32>
    %9 = arith.mulf %8, %5 : vector<128x32xf32>
    %10 = arith.mulf %9, %5 : vector<128x32xf32>
    %11 = arith.mulf %10, %5 : vector<128x32xf32>
    %12 = arith.addf %5, %11 : vector<128x32xf32>
    %cst_7 = arith.constant 0.797884583 : f32
    %13 = vector.broadcast %cst_7 : f32 to vector<128x32xf32>
    %14 = arith.mulf %13, %12 : vector<128x32xf32>
    %15 = math.tanh %14 : vector<128x32xf32>
    %cst_8 = arith.constant 1.000000e+00 : f32
    %16 = vector.broadcast %cst_8 : f32 to vector<128x32xf32>
    %17 = arith.addf %16, %15 : vector<128x32xf32>
    %18 = arith.mulf %7, %17 : vector<128x32xf32>
    %c0_9 = arith.constant 0 : index
    %c0_10 = arith.constant 0 : index
    %c0_11 = arith.constant 0 : index
    %19 = vector.load %arg5[%c0_9, %c0_10, %c0_11] : memref<3x32x32xf32, #tpu.memory_space<vmem>>, vector<1x32x32xf32>
    %20 = vector.shape_cast %19 : vector<1x32x32xf32> to vector<32x32xf32>
    %cst_12 = arith.constant dense<0.000000e+00> : vector<128x32xf32>
    %21 = tpu.matmul %18, %20, %cst_12 {dimension_numbers = #tpu.dot_dimension_numbers<[1], [0], [0], [1], [0, 0, 1, 1], [], []>} : vector<128x32xf32>, vector<32x32xf32>, vector<128x32xf32> -> vector<128x32xf32>
    %c0_13 = arith.constant 0 : index
    %c0_14 = arith.constant 0 : index
    %c0_15 = arith.constant 0 : index
    %22 = vector.load %arg6[%c0_13, %c0_14, %c0_15] : memref<3x1x32xf32, #tpu.memory_space<vmem>>, vector<1x1x32xf32>
    %23 = vector.shape_cast %22 : vector<1x1x32xf32> to vector<1x32xf32>
    %24 = vector.broadcast %23 : vector<1x32xf32> to vector<128x32xf32>
    %25 = arith.addf %21, %24 : vector<128x32xf32>
    %cst_16 = arith.constant 5.000000e-01 : f32
    %26 = vector.broadcast %cst_16 : f32 to vector<128x32xf32>
    %27 = arith.mulf %26, %25 : vector<128x32xf32>
    %cst_17 = arith.constant 4.471500e-02 : f32
    %28 = vector.broadcast %cst_17 : f32 to vector<128x32xf32>
    %29 = arith.mulf %28, %25 : vector<128x32xf32>
    %30 = arith.mulf %29, %25 : vector<128x32xf32>
    %31 = arith.mulf %30, %25 : vector<128x32xf32>
    %32 = arith.addf %25, %31 : vector<128x32xf32>
    %cst_18 = arith.constant 0.797884583 : f32
    %33 = vector.broadcast %cst_18 : f32 to vector<128x32xf32>
    %34 = arith.mulf %33, %32 : vector<128x32xf32>
    %35 = math.tanh %34 : vector<128x32xf32>
    %cst_19 = arith.constant 1.000000e+00 : f32
    %36 = vector.broadcast %cst_19 : f32 to vector<128x32xf32>
    %37 = arith.addf %36, %35 : vector<128x32xf32>
    %38 = arith.mulf %27, %37 : vector<128x32xf32>
    %c1 = arith.constant 1 : index
    %c0_20 = arith.constant 0 : index
    %c0_21 = arith.constant 0 : index
    %39 = vector.load %arg5[%c1, %c0_20, %c0_21] : memref<3x32x32xf32, #tpu.memory_space<vmem>>, vector<1x32x32xf32>
    %40 = vector.shape_cast %39 : vector<1x32x32xf32> to vector<32x32xf32>
    %cst_22 = arith.constant dense<0.000000e+00> : vector<128x32xf32>
    %41 = tpu.matmul %38, %40, %cst_22 {dimension_numbers = #tpu.dot_dimension_numbers<[1], [0], [0], [1], [0, 0, 1, 1], [], []>} : vector<128x32xf32>, vector<32x32xf32>, vector<128x32xf32> -> vector<128x32xf32>
    %c1_23 = arith.constant 1 : index
    %c0_24 = arith.constant 0 : index
    %c0_25 = arith.constant 0 : index
    %42 = vector.load %arg6[%c1_23, %c0_24, %c0_25] : memref<3x1x32xf32, #tpu.memory_space<vmem>>, vector<1x1x32xf32>
    %43 = vector.shape_cast %42 : vector<1x1x32xf32> to vector<1x32xf32>
    %44 = vector.broadcast %43 : vector<1x32xf32> to vector<128x32xf32>
    %45 = arith.addf %41, %44 : vector<128x32xf32>
    %cst_26 = arith.constant 5.000000e-01 : f32
    %46 = vector.broadcast %cst_26 : f32 to vector<128x32xf32>
    %47 = arith.mulf %46, %45 : vector<128x32xf32>
    %cst_27 = arith.constant 4.471500e-02 : f32
    %48 = vector.broadcast %cst_27 : f32 to vector<128x32xf32>
    %49 = arith.mulf %48, %45 : vector<128x32xf32>
    %50 = arith.mulf %49, %45 : vector<128x32xf32>
    %51 = arith.mulf %50, %45 : vector<128x32xf32>
    %52 = arith.addf %45, %51 : vector<128x32xf32>
    %cst_28 = arith.constant 0.797884583 : f32
    %53 = vector.broadcast %cst_28 : f32 to vector<128x32xf32>
    %54 = arith.mulf %53, %52 : vector<128x32xf32>
    %55 = math.tanh %54 : vector<128x32xf32>
    %cst_29 = arith.constant 1.000000e+00 : f32
    %56 = vector.broadcast %cst_29 : f32 to vector<128x32xf32>
    %57 = arith.addf %56, %55 : vector<128x32xf32>
    %58 = arith.mulf %47, %57 : vector<128x32xf32>
    %c0_30 = arith.constant 0 : index
    %c0_31 = arith.constant 0 : index
    %c0_32 = arith.constant 0 : index
    %59 = vector.load %arg2[%c0_30, %c0_31, %c0_32] : memref<2x128x32xf32, #tpu.memory_space<vmem>>, vector<1x128x32xf32>
    %60 = vector.shape_cast %59 : vector<1x128x32xf32> to vector<128x32xf32>
    %61 = arith.mulf %58, %60 : vector<128x32xf32>
    %c2 = arith.constant 2 : index
    %c0_33 = arith.constant 0 : index
    %c0_34 = arith.constant 0 : index
    %62 = vector.load %arg5[%c2, %c0_33, %c0_34] : memref<3x32x32xf32, #tpu.memory_space<vmem>>, vector<1x32x32xf32>
    %63 = vector.shape_cast %62 : vector<1x32x32xf32> to vector<32x32xf32>
    %cst_35 = arith.constant dense<0.000000e+00> : vector<128x32xf32>
    %64 = tpu.matmul %61, %63, %cst_35 {dimension_numbers = #tpu.dot_dimension_numbers<[1], [0], [0], [1], [0, 0, 1, 1], [], []>} : vector<128x32xf32>, vector<32x32xf32>, vector<128x32xf32> -> vector<128x32xf32>
    %c2_36 = arith.constant 2 : index
    %c0_37 = arith.constant 0 : index
    %c0_38 = arith.constant 0 : index
    %65 = vector.load %arg6[%c2_36, %c0_37, %c0_38] : memref<3x1x32xf32, #tpu.memory_space<vmem>>, vector<1x1x32xf32>
    %66 = vector.shape_cast %65 : vector<1x1x32xf32> to vector<1x32xf32>
    %67 = vector.broadcast %66 : vector<1x32xf32> to vector<128x32xf32>
    %68 = arith.addf %64, %67 : vector<128x32xf32>
    %cst_39 = arith.constant 5.000000e-01 : f32
    %69 = vector.broadcast %cst_39 : f32 to vector<128x32xf32>
    %70 = arith.mulf %69, %68 : vector<128x32xf32>
    %cst_40 = arith.constant 4.471500e-02 : f32
    %71 = vector.broadcast %cst_40 : f32 to vector<128x32xf32>
    %72 = arith.mulf %71, %68 : vector<128x32xf32>
    %73 = arith.mulf %72, %68 : vector<128x32xf32>
    %74 = arith.mulf %73, %68 : vector<128x32xf32>
    %75 = arith.addf %68, %74 : vector<128x32xf32>
    %cst_41 = arith.constant 0.797884583 : f32
    %76 = vector.broadcast %cst_41 : f32 to vector<128x32xf32>
    %77 = arith.mulf %76, %75 : vector<128x32xf32>
    %78 = math.tanh %77 : vector<128x32xf32>
    %cst_42 = arith.constant 1.000000e+00 : f32
    %79 = vector.broadcast %cst_42 : f32 to vector<128x32xf32>
    %80 = arith.addf %79, %78 : vector<128x32xf32>
    %81 = arith.mulf %70, %80 : vector<128x32xf32>
    %c1_43 = arith.constant 1 : index
    %c0_44 = arith.constant 0 : index
    %c0_45 = arith.constant 0 : index
    %82 = vector.load %arg2[%c1_43, %c0_44, %c0_45] : memref<2x128x32xf32, #tpu.memory_space<vmem>>, vector<1x128x32xf32>
    %83 = vector.shape_cast %82 : vector<1x128x32xf32> to vector<128x32xf32>
    %84 = arith.mulf %81, %83 : vector<128x32xf32>
    %c0_46 = arith.constant 0 : index
    %c0_47 = arith.constant 0 : index
    %85 = vector.load %arg7[%c0_46, %c0_47] : memref<32x128xf32, #tpu.memory_space<vmem>>, vector<32x128xf32>
    %cst_48 = arith.constant dense<0.000000e+00> : vector<128x128xf32>
    %86 = tpu.matmul %84, %85, %cst_48 {dimension_numbers = #tpu.dot_dimension_numbers<[1], [0], [0], [1], [0, 0, 1, 1], [], []>} : vector<128x32xf32>, vector<32x128xf32>, vector<128x128xf32> -> vector<128x128xf32>
    %c0_49 = arith.constant 0 : index
    %c0_50 = arith.constant 0 : index
    %87 = vector.load %arg8[%c0_49, %c0_50] : memref<1x128xf32, #tpu.memory_space<vmem>>, vector<1x128xf32>
    %88 = vector.broadcast %87 : vector<1x128xf32> to vector<128x128xf32>
    %89 = arith.addf %86, %88 : vector<128x128xf32>
    %90 = arith.negf %89 : vector<128x128xf32>
    %91 = math.exp %90 : vector<128x128xf32>
    %cst_51 = arith.constant 1.000000e+00 : f32
    %92 = vector.broadcast %cst_51 : f32 to vector<128x128xf32>
    %93 = arith.addf %92, %91 : vector<128x128xf32>
    %94 = arith.divf %92, %93 : vector<128x128xf32>
    %c0_52 = arith.constant 0 : index
    %c0_53 = arith.constant 0 : index
    %95 = vector.load %arg9[%c0_52, %c0_53] : memref<128x128xf32, #tpu.memory_space<vmem>>, vector<128x128xf32>
    tpu.vector_store %arg9[%c0_52, %c0_53], %94 {strides = array<i32>} : memref<128x128xf32, #tpu.memory_space<vmem>>, vector<128x128xf32>,
    return
  }
  func.func @transform_0(%arg0: i32) -> (i32, i32) {
    %c0_i32 = arith.constant 0 : i32
    %c0_i32_0 = arith.constant 0 : i32
    return %arg0, %c0_i32 : i32, i32
  }
  func.func @transform_1(%arg0: i32) -> (i32, i32, i32) {
    %c0_i32 = arith.constant 0 : i32
    %c0_i32_0 = arith.constant 0 : i32
    %c0_i32_1 = arith.constant 0 : i32
    return %c0_i32, %arg0, %c0_i32_0 : i32, i32, i32
  }
  func.func @transform_2(%arg0: i32) -> (i32, i32) {
    %c0_i32 = arith.constant 0 : i32
    %c0_i32_0 = arith.constant 0 : i32
    %c0_i32_1 = arith.constant 0 : i32
    return %c0_i32, %c0_i32_0 : i32, i32
  }
  func.func @transform_3(%arg0: i32) -> (i32, i32) {
    %c0_i32 = arith.constant 0 : i32
    %c0_i32_0 = arith.constant 0 : i32
    %c0_i32_1 = arith.constant 0 : i32
    return %c0_i32, %c0_i32_0 : i32, i32
  }
  func.func @transform_4(%arg0: i32) -> (i32, i32, i32) {
    %c0_i32 = arith.constant 0 : i32
    %c0_i32_0 = arith.constant 0 : i32
    %c0_i32_1 = arith.constant 0 : i32
    %c0_i32_2 = arith.constant 0 : i32
    return %c0_i32, %c0_i32_0, %c0_i32_1 : i32, i32, i32
  }
  func.func @transform_5(%arg0: i32) -> (i32, i32, i32) {
    %c0_i32 = arith.constant 0 : i32
    %c0_i32_0 = arith.constant 0 : i32
    %c0_i32_1 = arith.constant 0 : i32
    %c0_i32_2 = arith.constant 0 : i32
    return %c0_i32, %c0_i32_0, %c0_i32_1 : i32, i32, i32
  }
  func.func @transform_6(%arg0: i32) -> (i32, i32) {
    %c0_i32 = arith.constant 0 : i32
    %c0_i32_0 = arith.constant 0 : i32
    %c0_i32_1 = arith.constant 0 : i32
    return %c0_i32, %c0_i32_0 : i32, i32
  }
  func.func @transform_7(%arg0: i32) -> (i32, i32) {
    %c0_i32 = arith.constant 0 : i32
    %c0_i32_0 = arith.constant 0 : i32
    %c0_i32_1 = arith.constant 0 : i32
    return %c0_i32, %c0_i32_0 : i32, i32
  }
  func.func @transform_8(%arg0: i32) -> (i32, i32) {
    %c0_i32 = arith.constant 0 : i32
    %c0_i32_0 = arith.constant 0 : i32
    return %arg0, %c0_i32 : i32, i32
  }
}

</mosaic_0001>

<bundles_post_ra>
// kernel: tpu_custom_call.1
= control target key start
LH: loop header
LB: loop body
LE: loop exit
PB: predicated region body
PF: predicated region fallthrough
CT: control target
= control target key end

     0   :  { %vm55_vm0 = vcmask 130048   ;;  %s3257_s0 = inlined_call_operand.vmem [shape: f32[128,16], index: 0, kind: input, shape index: {}]   ;;  %s3258_s1 = inlined_call_operand.vmem [shape: f32[2,128,32], index: 1, kind: input, shape index: {}]   ;;  %s3259_s2 = inlined_call_operand.vmem [shape: f32[16,32], index: 2, kind: input, shape index: {}]   ;;  %s3260_s3 = inlined_call_operand.vmem [shape: f32[1,32], index: 3, kind: input, shape index: {}]   ;;  %s3261_s4 = inlined_call_operand.vmem [shape: f32[3,32,32], index: 4, kind: input, shape index: {}]   ;;  %s3262_s5 = inlined_call_operand.vmem [shape: f32[3,1,32], index: 5, kind: input, shape index: {}]   ;;  %s3263_s6 = inlined_call_operand.vmem [shape: f32[32,128], index: 6, kind: input, shape index: {}]   ;;  %s3264_s7 = inlined_call_operand.vmem [shape: f32[1,128], index: 7, kind: input, shape index: {}]   ;;  %s3265_s8 = inlined_call_operand.hbm [shape: f32[128,128], index: 8, kind: output, shape index: {}]  }
   0x1   :  { %v46_v0 = vld [vmem:[%s3259_s2] sm:$0xff]  ;;  %v47_v1 = vld [vmem:[%s3259_s2 + $0x8] sm:$0xff]  ;;  %v32_v7 = vld [vmem:[%s3257_s0 + $0x10] sm:$0xff] }
   0x2   :  { %v30_v2 = vld [vmem:[%s3257_s0] sm:$0xff]  ;;  %v2220_v3 = vpack.c.bf16 %v47_v1, %v46_v0  ;;  %v31_v5 = vld [vmem:[%s3257_s0 + $0x8] sm:$0xff]  ;;  %v40_v8 = vld [vmem:[%s3257_s0 + $0x50] sm:$0xff] }
   0x3   :  { %2068 = vmatprep.mubr.msk.f32.mxu0 %vm55_vm0, %v30_v2  ;;  %v38_v4 = vld [vmem:[%s3257_s0 + $0x40] sm:$0xff]  ;;  %v39_v6 = vld [vmem:[%s3257_s0 + $0x48] sm:$0xff] }
   0x4   :  { %2080 = vmatprep.mubr.msk.f32.mxu1 %vm55_vm0, %v38_v4  ;;  %2221 = vmatprep.subr.bf16.mxu0 %v2220_v3 }
   0x5   :  { %2256 = vmatprep.subr.bf16.mxu1 %v2220_v3  ;;  %2223 = vmatpush3.bf16.msra.mxu0 %v2220_v3 }
   0x6   :  { %2257 = vmatpush3.bf16.msra.mxu1 %v2220_v3 }
   0x7   :  { %13 = vsyncpa [#allocation3], 0  ;;  %v33_v9 = vld [vmem:[%s3257_s0 + $0x18] sm:$0xff]  ;;  %v34_v11 = vld [vmem:[%s3257_s0 + $0x20] sm:$0xff]  ;;  %vm404_vm1 = vcmask 261120  }
   0x8   :  { %2069 = vmatmul.mubr.msk.f32.vlgmr.msra.gmra.mrb[0].mxu0 %vm55_vm0, %v31_v5  ;;  %v41_v10 = vld [vmem:[%s3257_s0 + $0x58] sm:$0xff]  ;;  %v42_v12 = vld [vmem:[%s3257_s0 + $0x60] sm:$0xff]  ;;  %v35_v13 = vld [vmem:[%s3257_s0 + $0x28] sm:$0xff] }
   0x9   :  { %2081 = vmatmul.mubr.msk.f32.vlgmr.msra.gmra.mrb[0].mxu1 %vm55_vm0, %v39_v6  ;;  %2071 = vmatprep.mubr.msk.f32.mxu0 %vm55_vm0, %v32_v7  ;;  %v43_v14 = vld [vmem:[%s3257_s0 + $0x68] sm:$0xff]  ;;  %v36_v15 = vld [vmem:[%s3257_s0 + $0x30] sm:$0xff]  ;;  %v37_v17 = vld [vmem:[%s3257_s0 + $0x38] sm:$0xff] }
   0xa   :  { %2083 = vmatprep.mubr.msk.f32.mxu1 %vm55_vm0, %v40_v8  ;;  %v44_v16 = vld [vmem:[%s3257_s0 + $0x70] sm:$0xff]  ;;  %v45_v18 = vld [vmem:[%s3257_s0 + $0x78] sm:$0xff]  ;;  %v393_v19 = vld [vmem:[%s3261_s4] sm:$0xff] }
   0xb   :  { %v394_v20 = vld [vmem:[%s3261_s4 + $0x8] sm:$0xff]  ;;  %v395_v22 = vld [vmem:[%s3261_s4 + $0x10] sm:$0xff]  ;;  %v396_v23 = vld [vmem:[%s3261_s4 + $0x18] sm:$0xff] }
   0xc   :  { %2072 = vmatmul.mubr.msk.f32.gmra.mrb[2].mxu0 %vm55_vm0, %v33_v9  ;;  %v2224_v21 = vpack.c.bf16 %v394_v20, %v393_v19  ;;  %v2228_v24 = vpack.c.bf16 %v396_v23, %v395_v22  ;;  %v2610_v25 = vld [vmem:[%s3260_s3] ss:$0 sm:$0xff] }
   0xd   :  { %2084 = vmatmul.mubr.msk.f32.gmra.mrb[2].mxu1 %vm55_vm0, %v41_v10  ;;  %2074 = vmatprep.mubr.msk.f32.mxu0 %vm55_vm0, %v34_v11 }
   0xe   :  { %2086 = vmatprep.mubr.msk.f32.mxu1 %vm55_vm0, %v42_v12  ;;  %2225 = vmatprep.subr.bf16.mxu1 %v2224_v21 }
   0xf   :  { %2227 = vmatpush3.bf16.msra.mxu1 %v2224_v21 }
  0x10   :  { %2075 = vmatmul.mubr.msk.f32.gmra.mrb[4].mxu0 %vm55_vm0, %v35_v13  ;;  %2229 = vmatprep.subr.bf16.mxu1 %v2228_v24 }
  0x11   :  { %2087 = vmatmul.mubr.msk.f32.gmra.mrb[4].mxu1 %vm55_vm0, %v43_v14  ;;  %2077 = vmatprep.mubr.msk.f32.mxu0 %vm55_vm0, %v36_v15 }
  0x12   :  { %2089 = vmatprep.mubr.msk.f32.mxu1 %vm55_vm0, %v44_v16 }
  0x13   :  { %2231 = vmatpush3.bf16.msra.mxu1 %v2228_v24 }
  0x14   :  { %2078 = vmatmul.mubr.msk.f32.gmra.mrb[6].mxu0 %vm55_vm0, %v37_v17 }
  0x15   :  { %2090 = vmatmul.mubr.msk.f32.gmra.mrb[6].mxu1 %vm55_vm0, %v45_v18 }
  0xdb   :  { %v2070_v26 = vpop.f32.mrb[0].mxu0 }
  0xdc   :  { %v2082_v27 = vpop.f32.mrb[0].mxu1  ;;  %v2613_v28 = vadd.f32 %v2070_v26, %v2610_v25  ;;  %v170_v29 = vpop.f32.mrb[1].mxu0 }
  0xdd   :  { %v210_v30 = vpop.f32.mrb[1].mxu1  ;;  %v2616_v31 = vadd.f32 %v2610_v25, %v170_v29  ;;  %v2624_v39 = vadd.f32 %v2082_v27, %v2610_v25 }
  0xde   :  { %v266_v32 = vmul.f32 0.044715, %v2613_v28  ;;  %v2632_v43 = vadd.f32 %v2610_v25, %v210_v30 }
  0xdf   :  { %v2073_v33 = vpop.f32.mrb[2].mxu0  ;;  %v265_v40 = vmul.f32 0.044715, %v2616_v31  ;;  %v274_v50 = vmul.f32 0.044715, %v2624_v39 }
  0xe0   :  { %v2085_v34 = vpop.f32.mrb[2].mxu1  ;;  %v282_v35 = vmul.f32 %v266_v32, %v2613_v28  ;;  %v2621_v36 = vadd.f32 %v2073_v33, %v2610_v25  ;;  %v180_v37 = vpop.f32.mrb[3].mxu0  ;;  %v273_v55 = vmul.f32 0.044715, %v2632_v43 }
  0xe1   :  { %v220_v38 = vpop.f32.mrb[3].mxu1  ;;  %v2628_v41 = vadd.f32 %v2610_v25, %v180_v37  ;;  %v281_v51 = vmul.f32 %v265_v40, %v2616_v31  ;;  %v290_v0 = vmul.f32 %v274_v50, %v2624_v39  ;;  %v2656_v3 = vadd.f32 %v2085_v34, %v2610_v25 }
  0xe2   :  { %v298_v42 = vmul.f32 %v282_v35, %v2613_v28  ;;  %v268_v47 = vmul.f32 0.044715, %v2621_v36  ;;  %v2649_v60 = vadd.f32 %v2610_v25, %v220_v38  ;;  %v289_v8 = vmul.f32 %v273_v55, %v2632_v43 }
  0xe3   :  { %v267_v44 = vmul.f32 0.044715, %v2628_v41  ;;  %v2076_v45 = vpop.f32.mrb[4].mxu0  ;;  %v297_v1 = vmul.f32 %v281_v51, %v2616_v31  ;;  %v276_v19 = vmul.f32 0.044715, %v2656_v3  ;;  %v306_v38 = vmul.f32 %v290_v0, %v2624_v39 }
  0xe4   :  { %v2088_v46 = vpop.f32.mrb[4].mxu1  ;;  %v190_v48 = vpop.f32.mrb[5].mxu0  ;;  %v2640_v53 = vadd.f32 %v2076_v45, %v2610_v25  ;;  %v314_v54 = vadd.f32 %v298_v42, %v2613_v28  ;;  %v284_v59 = vmul.f32 %v268_v47, %v2621_v36  ;;  %v275_v12 = vmul.f32 0.044715, %v2649_v60 }
  0xe5   :  { %v230_v49 = vpop.f32.mrb[5].mxu1  ;;  %v283_v52 = vmul.f32 %v267_v44, %v2628_v41  ;;  %v2645_v56 = vadd.f32 %v2610_v25, %v190_v48  ;;  %v313_v15 = vadd.f32 %v297_v1, %v2616_v31  ;;  %v2681_v21 = vadd.f32 %v2088_v46, %v2610_v25 }
  0xe6   :  { %v270_v61 = vmul.f32 0.044715, %v2640_v53  ;;  %v330_v7 = vmul.f32 0.7978846, %v314_v54  ;;  %v300_v11 = vmul.f32 %v284_v59, %v2621_v36  ;;  %v2671_v13 = vadd.f32 %v2610_v25, %v230_v49 }
  0xe7   :  { %v2079_v57 = vpop.f32.mrb[6].mxu0  ;;  %v269_v2 = vmul.f32 0.044715, %v2645_v56  ;;  %v299_v4 = vmul.f32 %v283_v52, %v2628_v41  ;;  %v305_v23 = vmul.f32 %v289_v8, %v2632_v43  ;;  %v291_v29 = vmul.f32 %v275_v12, %v2649_v60 }
  0xe8   :  { %v2091_v58 = vpop.f32.mrb[6].mxu1  ;;  %v200_v62 = vpop.f32.mrb[7].mxu0  ;;  %v286_v5 = vmul.f32 %v270_v61, %v2640_v53  ;;  %v2661_v6 = vadd.f32 %v2079_v57, %v2610_v25  ;;  %2261 = vtanh.f32 %v330_v7  ;;  %v316_v27 = vadd.f32 %v300_v11, %v2621_v36 }
  0xe9   :  { %v240_v63 = vpop.f32.mrb[7].mxu1  ;;  %v285_v9 = vmul.f32 %v269_v2, %v2645_v56  ;;  %v2666_v10 = vadd.f32 %v2610_v25, %v200_v62  ;;  %v315_v20 = vadd.f32 %v299_v4, %v2628_v41  ;;  %v277_v30 = vmul.f32 0.044715, %v2671_v13 }
  0xea   :  { %v272_v14 = vmul.f32 0.044715, %v2661_v6  ;;  %v302_v16 = vmul.f32 %v286_v5, %v2640_v53  ;;  %v2687_v26 = vadd.f32 %v2610_v25, %v240_v63  ;;  %v329_v37 = vmul.f32 0.7978846, %v313_v15 }
  0xeb   :  { %v301_v17 = vmul.f32 %v285_v9, %v2645_v56  ;;  %v271_v18 = vmul.f32 0.044715, %v2666_v10  ;;  %v292_v40 = vmul.f32 %v276_v19, %v2656_v3  ;;  %v278_v42 = vmul.f32 0.044715, %v2681_v21 }
  0xec   :  { %v288_v22 = vmul.f32 %v272_v14, %v2661_v6  ;;  %v318_v33 = vadd.f32 %v302_v16, %v2640_v53  ;;  %v331_v44 = vmul.f32 0.7978846, %v315_v20  ;;  %v2700_v45 = vadd.f32 %v2091_v58, %v2610_v25 }
  0xed   :  { %v287_v24 = vmul.f32 %v271_v18, %v2666_v10  ;;  %v317_v34 = vadd.f32 %v301_v17, %v2645_v56  ;;  %v279_v47 = vmul.f32 0.044715, %v2687_v26  ;;  %2263 = vtanh.f32 %v329_v37 }
  0xee   :  { %v304_v32 = vmul.f32 %v288_v22, %v2661_v6  ;;  %v321_v48 = vadd.f32 %v305_v23, %v2632_v43  ;;  %2265 = vtanh.f32 %v331_v44  ;;  %v332_v50 = vmul.f32 0.7978846, %v316_v27 }
  0xef   :  { %v303_v35 = vmul.f32 %v287_v24, %v2666_v10  ;;  %v307_v51 = vmul.f32 %v291_v29, %v2649_v60  ;;  %v293_v52 = vmul.f32 %v277_v30, %v2671_v13  ;;  %v333_v54 = vmul.f32 0.7978846, %v317_v34 }
  0xf0   :  { %v320_v49 = vadd.f32 %v304_v32, %v2661_v6  ;;  %v334_v55 = vmul.f32 0.7978846, %v318_v33  ;;  %v294_v25 = vmul.f32 %v278_v42, %v2681_v21  ;;  %2267 = vtanh.f32 %v332_v50 }
  0xf1   :  { %v319_v46 = vadd.f32 %v303_v35, %v2666_v10  ;;  %v280_v58 = vmul.f32 0.044715, %v2700_v45  ;;  %v295_v59 = vmul.f32 %v279_v47, %v2687_v26  ;;  %2269 = vtanh.f32 %v333_v54 }
  0xf2   :  { %v322_v61 = vadd.f32 %v306_v38, %v2624_v39  ;;  %v308_v62 = vmul.f32 %v292_v40, %v2656_v3  ;;  %2271 = vtanh.f32 %v334_v55  ;;  %v336_v63 = vmul.f32 0.7978846, %v320_v49  ;;  %v2262_v0 = vpop.eup %2261 }
  0xf3   :  { %v335_v57 = vmul.f32 0.7978846, %v319_v46  ;;  %v323_v1 = vadd.f32 %v307_v51, %v2649_v60  ;;  %v309_v2 = vmul.f32 %v293_v52, %v2671_v13  ;;  %v337_v4 = vmul.f32 0.7978846, %v321_v48 }
  0xf4   :  { %v310_v5 = vmul.f32 %v294_v25, %v2681_v21  ;;  %v296_v7 = vmul.f32 %v280_v58, %v2700_v45  ;;  %v311_v8 = vmul.f32 %v295_v59, %v2687_v26  ;;  %v362_v9 = vadd.f32 1.0, %v2262_v0 }
  0xf5   :  { %2273 = vtanh.f32 %v335_v57  ;;  %v324_v11 = vadd.f32 %v308_v62, %v2656_v3  ;;  %v338_v12 = vmul.f32 0.7978846, %v322_v61  ;;  %v325_v15 = vadd.f32 %v309_v2, %v2671_v13 }
  0xf6   :  { %2275 = vtanh.f32 %v336_v63  ;;  %v339_v16 = vmul.f32 0.7978846, %v323_v1  ;;  %v250_v18 = vmul.f32 0.5, %v2613_v28  ;;  %v326_v19 = vadd.f32 %v310_v5, %v2681_v21 }
  0xf7   :  { %v2264_v14 = vpop.eup %2263  ;;  %2277 = vtanh.f32 %v337_v4  ;;  %v249_v20 = vmul.f32 0.5, %v2616_v31  ;;  %v312_v23 = vmul.f32 %v296_v7, %v2700_v45  ;;  %v327_v24 = vadd.f32 %v311_v8, %v2687_v26 }
  0xf8   :  { %v2266_v17 = vpop.eup %2265  ;;  %v361_v22 = vadd.f32 1.0, %v2264_v14  ;;  %v251_v27 = vmul.f32 0.5, %v2628_v41  ;;  %v378_v32 = vmul.f32 %v362_v9, %v250_v18  ;;  %2279 = vtanh.f32 %v338_v12 }
  0xf9   :  { %v363_v29 = vadd.f32 1.0, %v2266_v17  ;;  %v340_v34 = vmul.f32 0.7978846, %v324_v11  ;;  %2281 = vtanh.f32 %v339_v16  ;;  %v341_v38 = vmul.f32 0.7978846, %v325_v15 }
  0xfa   :  { %v2268_v30 = vpop.eup %2267  ;;  %v377_v33 = vmul.f32 %v361_v22, %v249_v20  ;;  %v253_v31 = vmul.f32 0.5, %v2645_v56  ;;  %v328_v41 = vadd.f32 %v312_v23, %v2700_v45  ;;  %v252_v46 = vmul.f32 0.5, %v2621_v36 }
  0xfb   :  { %v2270_v35 = vpop.eup %2269  ;;  %v379_v37 = vmul.f32 %v363_v29, %v251_v27  ;;  %v364_v28 = vadd.f32 1.0, %v2268_v30  ;;  %2283 = vtanh.f32 %v340_v34  ;;  %v342_v49 = vmul.f32 0.7978846, %v326_v19  ;;  %v1895_v34 = vld [vmem:[%s3261_s4 + $0x40] sm:$0xff] }
  0xfc   :  { %v2272_v40 = vpop.eup %2271  ;;  %2100 = vmatprep.mubr.msk.f32.mxu1 %vm404_vm1, %v377_v33  ;;  %v365_v42 = vadd.f32 1.0, %v2270_v35  ;;  %2285 = vtanh.f32 %v341_v38  ;;  %v343_v52 = vmul.f32 0.7978846, %v327_v24  ;;  %v255_v56 = vmul.f32 0.5, %v2666_v10  ;;  %v1896_v35 = vld [vmem:[%s3261_s4 + $0x48] sm:$0xff] }
  0xfd   :  { %2101 = vmatmul.mubr.msk.f32.vlgmr.msra.gmra.mrb[8].mxu1 %vm404_vm1, %v378_v32  ;;  %v380_v50 = vmul.f32 %v364_v28, %v252_v46  ;;  %v366_v51 = vadd.f32 1.0, %v2272_v40  ;;  %v254_v25 = vmul.f32 0.5, %v2640_v53  ;;  %2287 = vtanh.f32 %v342_v49  ;;  %v1876_v32 = vld [vmem:[%s3261_s4 + $0x38] sm:$0xff]  ;;  %v2777_v28 = vld [vmem:[%s3262_s5] ss:$0 sm:$0xff] }
  0xfe   :  { %2103 = vmatprep.mubr.msk.f32.mxu1 %vm404_vm1, %v379_v37  ;;  %v381_v47 = vmul.f32 %v365_v42, %v253_v31  ;;  %v344_v57 = vmul.f32 0.7978846, %v328_v41  ;;  %2289 = vtanh.f32 %v343_v52  ;;  %v256_v10 = vmul.f32 0.5, %v2661_v6 }
  0xff   :  { %v2274_v44 = vpop.eup %2273  ;;  %v382_v58 = vmul.f32 %v366_v51, %v254_v25  ;;  %v257_v0 = vmul.f32 0.5, %v2632_v43  ;;  %v258_v8 = vmul.f32 0.5, %v2624_v39  ;;  %v259_v9 = vmul.f32 0.5, %v2649_v60 }
 0x100   :  { %v367_v48 = vadd.f32 1.0, %v2274_v44  ;;  %v2276_v54 = vpop.eup %2275  ;;  %2291 = vtanh.f32 %v344_v57  ;;  %v260_v16 = vmul.f32 0.5, %v2656_v3  ;;  %v261_v17 = vmul.f32 0.5, %v2671_v13 }
 0x101   :  { %v2278_v55 = vpop.eup %2277  ;;  %2104 = vmatmul.mubr.msk.f32.gmra.mrb[10].mxu1 %vm404_vm1, %v380_v50  ;;  %v368_v59 = vadd.f32 1.0, %v2276_v54  ;;  %v262_v60 = vmul.f32 0.5, %v2681_v21  ;;  %v263_v23 = vmul.f32 0.5, %v2687_v26  ;;  %v264_v13 = vmul.f32 0.5, %v2700_v45  ;;  %v1873_v21 = vld [vmem:[%s3261_s4 + $0x20] sm:$0xff]  ;;  %v1874_v26 = vld [vmem:[%s3261_s4 + $0x28] sm:$0xff] }
 0x102   :  { %2106 = vmatprep.mubr.msk.f32.mxu1 %vm404_vm1, %v381_v47  ;;  %v383_v36 = vmul.f32 %v367_v48, %v255_v56  ;;  %v2280_v61 = vpop.eup %2279  ;;  %v369_v62 = vadd.f32 1.0, %v2278_v55  ;;  %v2232_v30 = vpack.c.bf16 %v1874_v26, %v1873_v21  ;;  %v1875_v45 = vld [vmem:[%s3261_s4 + $0x30] sm:$0xff]  ;;  %v2240_v37 = vpack.c.bf16 %v1896_v35, %v1895_v34 }
 0x103   :  { %v2282_v63 = vpop.eup %2281  ;;  %v384_v53 = vmul.f32 %v368_v59, %v256_v10  ;;  %v370_v1 = vadd.f32 1.0, %v2280_v61  ;;  %v2236_v33 = vpack.c.bf16 %v1876_v32, %v1875_v45 }
 0x104   :  { %v385_v4 = vmul.f32 %v369_v62, %v257_v0  ;;  %v371_v5 = vadd.f32 1.0, %v2282_v63  ;;  %2233 = vmatprep.subr.bf16.mxu0 %v2232_v30  ;;  %2241 = vmatprep.subr.bf16.mxu1 %v2240_v37 }
 0x105   :  { %2107 = vmatmul.mubr.msk.f32.gmra.mrb[12].mxu1 %vm404_vm1, %v382_v58  ;;  %v2284_v2 = vpop.eup %2283  ;;  %v386_v6 = vmul.f32 %v370_v1, %v258_v8  ;;  %2235 = vmatpush3.bf16.msra.mxu0 %v2232_v30 }
 0x106   :  { %2109 = vmatprep.mubr.msk.f32.mxu1 %vm404_vm1, %v383_v36  ;;  %v2286_v7 = vpop.eup %2285  ;;  %v372_v11 = vadd.f32 1.0, %v2284_v2  ;;  %v387_v14 = vmul.f32 %v371_v5, %v259_v9  ;;  %2237 = vmatprep.subr.bf16.mxu0 %v2236_v33 }
 0x107   :  { %v2288_v12 = vpop.eup %2287  ;;  %v373_v43 = vadd.f32 1.0, %v2286_v7  ;;  %2243 = vmatpush3.bf16.msra.mxu1 %v2240_v37 }
 0x108   :  { %v2290_v15 = vpop.eup %2289  ;;  %v388_v18 = vmul.f32 %v372_v11, %v260_v16  ;;  %v374_v39 = vadd.f32 1.0, %v2288_v12 }
 0x109   :  { %2110 = vmatmul.mubr.msk.f32.gmra.mrb[14].mxu1 %vm404_vm1, %v384_v53  ;;  %v389_v20 = vmul.f32 %v373_v43, %v261_v17  ;;  %v375_v22 = vadd.f32 1.0, %v2290_v15  ;;  %2239 = vmatpush3.bf16.msra.mxu0 %v2236_v33 }
 0x10a   :  { %2112 = vmatprep.mubr.msk.f32.mxu1 %vm404_vm1, %v385_v4  ;;  %v2292_v19 = vpop.eup %2291  ;;  %v390_v24 = vmul.f32 %v374_v39, %v262_v60 }
 0x10b   :  { %v376_v27 = vadd.f32 1.0, %v2292_v19  ;;  %v391_v3 = vmul.f32 %v375_v22, %v263_v23 }
 0x10d   :  { %2113 = vmatmul.mubr.msk.f32.gmra.mrb[16].mxu1 %vm404_vm1, %v386_v6  ;;  %v392_v29 = vmul.f32 %v376_v27, %v264_v13 }
 0x10e   :  { %2115 = vmatprep.mubr.msk.f32.mxu1 %vm404_vm1, %v387_v14 }
 0x111   :  { %2116 = vmatmul.mubr.msk.f32.gmra.mrb[18].mxu1 %vm404_vm1, %v388_v18 }
 0x112   :  { %2118 = vmatprep.mubr.msk.f32.mxu1 %vm404_vm1, %v389_v20 }
 0x115   :  { %2119 = vmatmul.mubr.msk.f32.gmra.mrb[20].mxu1 %vm404_vm1, %v390_v24 }
 0x116   :  { %2121 = vmatprep.mubr.msk.f32.mxu1 %vm404_vm1, %v391_v3 }
 0x119   :  { %2122 = vmatmul.mubr.msk.f32.gmra.mrb[22].mxu1 %vm404_vm1, %v392_v29 }
 0x1d0   :  { %v2102_v38 = vpop.f32.mrb[8].mxu1 }
 0x1d1   :  { %v525_v40 = vadd.f32 %v2102_v38, %v2777_v28  ;;  %v519_v31 = vpop.f32.mrb[9].mxu1 }
 0x1d2   :  { %v520_v42 = vadd.f32 %v2777_v28, %v519_v31 }
 0x1d3   :  { %v615_v44 = vmul.f32 0.044715, %v525_v40  ;;  %v599_v43 = vmul.f32 0.5, %v525_v40 }
 0x1d4   :  { %v614_v41 = vmul.f32 0.044715, %v520_v42  ;;  %v2105_v46 = vpop.f32.mrb[10].mxu1  ;;  %v598_v20 = vmul.f32 0.5, %v520_v42 }
 0x1d5   :  { %v631_v47 = vmul.f32 %v615_v44, %v525_v40  ;;  %v535_v48 = vadd.f32 %v2105_v46, %v2777_v28  ;;  %v529_v49 = vpop.f32.mrb[11].mxu1 }
 0x1d6   :  { %v630_v50 = vmul.f32 %v614_v41, %v520_v42  ;;  %v530_v51 = vadd.f32 %v2777_v28, %v529_v49 }
 0x1d7   :  { %v647_v52 = vmul.f32 %v631_v47, %v525_v40  ;;  %v617_v54 = vmul.f32 0.044715, %v535_v48  ;;  %v601_v30 = vmul.f32 0.5, %v535_v48 }
 0x1d8   :  { %v646_v56 = vmul.f32 %v630_v50, %v520_v42  ;;  %v616_v55 = vmul.f32 0.044715, %v530_v51  ;;  %v2108_v25 = vpop.f32.mrb[12].mxu1  ;;  %v600_v35 = vmul.f32 0.5, %v530_v51 }
 0x1d9   :  { %v663_v36 = vadd.f32 %v647_v52, %v525_v40  ;;  %v633_v57 = vmul.f32 %v617_v54, %v535_v48  ;;  %v2784_v58 = vadd.f32 %v2108_v25, %v2777_v28  ;;  %v539_v59 = vpop.f32.mrb[13].mxu1 }
 0x1da   :  { %v662_v61 = vadd.f32 %v646_v56, %v520_v42  ;;  %v632_v62 = vmul.f32 %v616_v55, %v530_v51  ;;  %v540_v63 = vadd.f32 %v2777_v28, %v539_v59 }
 0x1db   :  { %v679_v10 = vmul.f32 0.7978846, %v663_v36  ;;  %v649_v0 = vmul.f32 %v633_v57, %v535_v48  ;;  %v619_v53 = vmul.f32 0.044715, %v2784_v58 }
 0x1dc   :  { %v648_v1 = vmul.f32 %v632_v62, %v530_v51  ;;  %v618_v2 = vmul.f32 0.044715, %v540_v63  ;;  %v2111_v4 = vpop.f32.mrb[14].mxu1  ;;  %v678_v5 = vmul.f32 0.7978846, %v662_v61  ;;  %v602_v50 = vmul.f32 0.5, %v540_v63 }
 0x1dd   :  { %2293 = vtanh.f32 %v679_v10  ;;  %v665_v7 = vadd.f32 %v649_v0, %v535_v48  ;;  %v635_v8 = vmul.f32 %v619_v53, %v2784_v58  ;;  %v2790_v9 = vadd.f32 %v2111_v4, %v2777_v28  ;;  %v549_v6 = vpop.f32.mrb[15].mxu1 }
 0x1de   :  { %v664_v11 = vadd.f32 %v648_v1, %v530_v51  ;;  %v634_v12 = vmul.f32 %v618_v2, %v540_v63  ;;  %v2793_v14 = vadd.f32 %v2777_v28, %v549_v6  ;;  %2295 = vtanh.f32 %v678_v5 }
 0x1df   :  { %v651_v15 = vmul.f32 %v635_v8, %v2784_v58  ;;  %v621_v16 = vmul.f32 0.044715, %v2790_v9  ;;  %v681_v17 = vmul.f32 0.7978846, %v665_v7 }
 0x1e0   :  { %v650_v18 = vmul.f32 %v634_v12, %v540_v63  ;;  %v620_v39 = vmul.f32 0.044715, %v2793_v14  ;;  %v2114_v19 = vpop.f32.mrb[16].mxu1  ;;  %v680_v22 = vmul.f32 0.7978846, %v664_v11 }
 0x1e1   :  { %v667_v60 = vadd.f32 %v651_v15, %v2784_v58  ;;  %v637_v23 = vmul.f32 %v621_v16, %v2790_v9  ;;  %v2801_v24 = vadd.f32 %v2114_v19, %v2777_v28  ;;  %v559_v27 = vpop.f32.mrb[17].mxu1  ;;  %2297 = vtanh.f32 %v681_v17 }
 0x1e2   :  { %v666_v3 = vadd.f32 %v650_v18, %v540_v63  ;;  %v636_v13 = vmul.f32 %v620_v39, %v2793_v14  ;;  %v2805_v29 = vadd.f32 %v2777_v28, %v559_v27  ;;  %2299 = vtanh.f32 %v680_v22 }
 0x1e3   :  { %v653_v21 = vmul.f32 %v637_v23, %v2790_v9  ;;  %v623_v26 = vmul.f32 0.044715, %v2801_v24  ;;  %v683_v45 = vmul.f32 0.7978846, %v667_v60 }
 0x1e4   :  { %v652_v32 = vmul.f32 %v636_v13, %v2793_v14  ;;  %v622_v33 = vmul.f32 0.044715, %v2805_v29  ;;  %v2117_v34 = vpop.f32.mrb[18].mxu1  ;;  %v682_v37 = vmul.f32 0.7978846, %v666_v3 }
 0x1e5   :  { %v669_v38 = vadd.f32 %v653_v21, %v2790_v9  ;;  %v639_v40 = vmul.f32 %v623_v26, %v2801_v24  ;;  %v2814_v31 = vadd.f32 %v2117_v34, %v2777_v28  ;;  %v569_v42 = vpop.f32.mrb[19].mxu1  ;;  %2301 = vtanh.f32 %v683_v45 }
 0x1e6   :  { %v668_v44 = vadd.f32 %v652_v32, %v2793_v14  ;;  %v638_v41 = vmul.f32 %v622_v33, %v2805_v29  ;;  %v2819_v46 = vadd.f32 %v2777_v28, %v569_v42  ;;  %2303 = vtanh.f32 %v682_v37 }
 0x1e7   :  { %v2294_v47 = vpop.eup %2293  ;;  %v655_v48 = vmul.f32 %v639_v40, %v2801_v24  ;;  %v625_v49 = vmul.f32 0.044715, %v2814_v31  ;;  %v685_v51 = vmul.f32 0.7978846, %v669_v38  ;;  %v603_v40 = vmul.f32 0.5, %v2784_v58 }
 0x1e8   :  { %v2296_v52 = vpop.eup %2295  ;;  %v711_v54 = vadd.f32 1.0, %v2294_v47  ;;  %v654_v56 = vmul.f32 %v638_v41, %v2805_v29  ;;  %v624_v55 = vmul.f32 0.044715, %v2819_v46  ;;  %v2120_v25 = vpop.f32.mrb[20].mxu1  ;;  %v684_v36 = vmul.f32 0.7978846, %v668_v44 }
 0x1e9   :  { %v671_v57 = vadd.f32 %v655_v48, %v2801_v24  ;;  %v641_v59 = vmul.f32 %v625_v49, %v2814_v31  ;;  %v2828_v61 = vadd.f32 %v2120_v25, %v2777_v28  ;;  %v579_v62 = vpop.f32.mrb[21].mxu1  ;;  %v710_v10 = vadd.f32 1.0, %v2296_v52 }
 0x1ea   :  { %v727_v0 = vmul.f32 %v711_v54, %v599_v43  ;;  %v670_v63 = vadd.f32 %v654_v56, %v2805_v29  ;;  %v640_v53 = vmul.f32 %v624_v55, %v2819_v46  ;;  %v2833_v1 = vadd.f32 %v2777_v28, %v579_v62 }
 0x1eb   :  { %v2298_v2 = vpop.eup %2297  ;;  %v657_v4 = vmul.f32 %v641_v59, %v2814_v31  ;;  %v627_v5 = vmul.f32 0.044715, %v2828_v61  ;;  %v726_v7 = vmul.f32 %v710_v10, %v598_v20  ;;  %2305 = vtanh.f32 %v684_v36 }
 0x1ec   :  { %v2300_v8 = vpop.eup %2299  ;;  %v656_v6 = vmul.f32 %v640_v53, %v2819_v46  ;;  %v626_v11 = vmul.f32 0.044715, %v2833_v1  ;;  %v2123_v12 = vpop.f32.mrb[22].mxu1  ;;  %v713_v43 = vadd.f32 1.0, %v2298_v2  ;;  %2307 = vtanh.f32 %v685_v51 }
 0x1ed   :  { %v673_v15 = vadd.f32 %v657_v4, %v2814_v31  ;;  %v643_v16 = vmul.f32 %v627_v5, %v2828_v61  ;;  %v2842_v17 = vadd.f32 %v2123_v12, %v2777_v28  ;;  %v589_v18 = vpop.f32.mrb[23].mxu1  ;;  %2132 = vmatprep.mubr.msk.f32.mxu0 %vm404_vm1, %v726_v7  ;;  %v712_v39 = vadd.f32 1.0, %v2300_v8 }
 0x1ee   :  { %v672_v19 = vadd.f32 %v656_v6, %v2819_v46  ;;  %v642_v20 = vmul.f32 %v626_v11, %v2833_v1  ;;  %v2848_v22 = vadd.f32 %v2777_v28, %v589_v18  ;;  %2133 = vmatmul.mubr.msk.f32.vlgmr.msra.gmra.mrb[8].mxu0 %vm404_vm1, %v727_v0  ;;  %v729_v60 = vmul.f32 %v713_v43, %v601_v30 }
 0x1ef   :  { %v2302_v23 = vpop.eup %2301  ;;  %v659_v27 = vmul.f32 %v643_v16, %v2828_v61  ;;  %v629_v3 = vmul.f32 0.044715, %v2842_v17  ;;  %v728_v13 = vmul.f32 %v712_v39, %v600_v35  ;;  %v686_v21 = vmul.f32 0.7978846, %v670_v63 }
 0x1f0   :  { %v2304_v26 = vpop.eup %2303  ;;  %v658_v45 = vmul.f32 %v642_v20, %v2833_v1  ;;  %v628_v32 = vmul.f32 0.044715, %v2848_v22  ;;  %v715_v33 = vadd.f32 1.0, %v2302_v23  ;;  %v687_v34 = vmul.f32 0.7978846, %v671_v57 }
 0x1f1   :  { %v675_v28 = vadd.f32 %v659_v27, %v2828_v61  ;;  %v645_v37 = vmul.f32 %v629_v3, %v2842_v17  ;;  %2135 = vmatprep.mubr.msk.f32.mxu0 %vm404_vm1, %v728_v13  ;;  %v714_v30 = vadd.f32 1.0, %v2304_v26  ;;  %2309 = vtanh.f32 %v686_v21 }
 0x1f2   :  { %v674_v38 = vadd.f32 %v658_v45, %v2833_v1  ;;  %v644_v35 = vmul.f32 %v628_v32, %v2848_v22  ;;  %2136 = vmatmul.mubr.msk.f32.gmra.mrb[10].mxu0 %vm404_vm1, %v729_v60  ;;  %2311 = vtanh.f32 %v687_v34  ;;  %v688_v41 = vmul.f32 0.7978846, %v672_v19 }
 0x1f3   :  { %v661_v42 = vmul.f32 %v645_v37, %v2842_v17  ;;  %v730_v44 = vmul.f32 %v714_v30, %v602_v50  ;;  %v731_v48 = vmul.f32 %v715_v33, %v603_v40  ;;  %v689_v49 = vmul.f32 0.7978846, %v673_v15  ;;  %v1508_v33 = vld [vmem:[%s3263_s6 + $0x8] sm:$0xff] }
 0x1f4   :  { %v660_v47 = vmul.f32 %v644_v35, %v2848_v22  ;;  %v690_v51 = vmul.f32 0.7978846, %v674_v38  ;;  %2313 = vtanh.f32 %v688_v41  ;;  %v691_v56 = vmul.f32 0.7978846, %v675_v28  ;;  %v2903_v28 = vld [vmem:[%s3262_s5 + $0x1] ss:$0 sm:$0xff] }
 0x1f5   :  { %v2306_v52 = vpop.eup %2305  ;;  %v677_v54 = vadd.f32 %v661_v42, %v2842_v17  ;;  %2138 = vmatprep.mubr.msk.f32.mxu0 %vm404_vm1, %v730_v44  ;;  %v604_v50 = vmul.f32 0.5, %v2793_v14  ;;  %2315 = vtanh.f32 %v689_v49  ;;  %v605_v36 = vmul.f32 0.5, %v2790_v9 }
 0x1f6   :  { %v2308_v55 = vpop.eup %2307  ;;  %v676_v58 = vadd.f32 %v660_v47, %v2848_v22  ;;  %2139 = vmatmul.mubr.msk.f32.gmra.mrb[12].mxu0 %vm404_vm1, %v731_v48  ;;  %v716_v25 = vadd.f32 1.0, %v2306_v52  ;;  %2317 = vtanh.f32 %v690_v51  ;;  %v606_v14 = vmul.f32 0.5, %v2805_v29 }
 0x1f7   :  { %v717_v57 = vadd.f32 1.0, %v2308_v55  ;;  %v693_v59 = vmul.f32 0.7978846, %v677_v54  ;;  %2319 = vtanh.f32 %v691_v56  ;;  %v607_v9 = vmul.f32 0.5, %v2801_v24 }
 0x1f8   :  { %v732_v62 = vmul.f32 %v716_v25, %v604_v50  ;;  %v692_v10 = vmul.f32 0.7978846, %v676_v58  ;;  %v608_v11 = vmul.f32 0.5, %v2819_v46  ;;  %v609_v15 = vmul.f32 0.5, %v2814_v31 }
 0x1f9   :  { %v733_v0 = vmul.f32 %v717_v57, %v605_v36  ;;  %2321 = vtanh.f32 %v693_v59  ;;  %v610_v24 = vmul.f32 0.5, %v2833_v1  ;;  %v611_v46 = vmul.f32 0.5, %v2828_v61  ;;  %v1897_v61 = vld [vmem:[%s3261_s4 + $0x50] sm:$0xff] }
 0x1fa   :  { %2141 = vmatprep.mubr.msk.f32.mxu0 %vm404_vm1, %v732_v62  ;;  %2323 = vtanh.f32 %v692_v10  ;;  %v612_v3 = vmul.f32 0.5, %v2848_v22  ;;  %v613_v26 = vmul.f32 0.5, %v2842_v17  ;;  %v1898_v22 = vld [vmem:[%s3261_s4 + $0x58] sm:$0xff]  ;;  %v1507_v17 = vld [vmem:[%s3263_s6] sm:$0xff] }
 0x1fb   :  { %v2310_v63 = vpop.eup %2309  ;;  %2142 = vmatmul.mubr.msk.f32.gmra.mrb[14].mxu0 %vm404_vm1, %v733_v0  ;;  %v2244_v32 = vpack.c.bf16 %v1898_v22, %v1897_v61  ;;  %v2248_v34 = vpack.c.bf16 %v1508_v33, %v1507_v17 }
 0x1fc   :  { %v2312_v53 = vpop.eup %2311  ;;  %v718_v2 = vadd.f32 1.0, %v2310_v63 }
 0x1fd   :  { %v719_v4 = vadd.f32 1.0, %v2312_v53  ;;  %2245 = vmatprep.subr.bf16.mxu1 %v2244_v32  ;;  %2249 = vmatprep.subr.bf16.mxu0 %v2248_v34 }
 0x1fe   :  { %v734_v5 = vmul.f32 %v718_v2, %v606_v14  ;;  %v2314_v7 = vpop.eup %2313  ;;  %2247 = vmatpush3.bf16.msra.mxu1 %v2244_v32  ;;  %2251 = vmatpush3.bf16.msra.mxu0 %v2248_v34 }
 0x1ff   :  { %v735_v8 = vmul.f32 %v719_v4, %v607_v9  ;;  %v2316_v6 = vpop.eup %2315  ;;  %v720_v12 = vadd.f32 1.0, %v2314_v7 }
 0x200   :  { %2144 = vmatprep.mubr.msk.f32.mxu0 %vm404_vm1, %v734_v5  ;;  %v2318_v43 = vpop.eup %2317  ;;  %v721_v16 = vadd.f32 1.0, %v2316_v6 }
 0x201   :  { %2145 = vmatmul.mubr.msk.f32.gmra.mrb[16].mxu0 %vm404_vm1, %v735_v8  ;;  %v2320_v29 = vpop.eup %2319  ;;  %v736_v18 = vmul.f32 %v720_v12, %v608_v11  ;;  %v722_v39 = vadd.f32 1.0, %v2318_v43 }
 0x202   :  { %v737_v20 = vmul.f32 %v721_v16, %v609_v15  ;;  %v723_v60 = vadd.f32 1.0, %v2320_v29 }
 0x203   :  { %v2322_v19 = vpop.eup %2321  ;;  %2147 = vmatprep.mubr.msk.f32.mxu0 %vm404_vm1, %v736_v18  ;;  %v738_v27 = vmul.f32 %v722_v39, %v610_v24 }
 0x204   :  { %v2324_v23 = vpop.eup %2323  ;;  %v739_v13 = vmul.f32 %v723_v60, %v611_v46  ;;  %v725_v1 = vadd.f32 1.0, %v2322_v19 }
 0x205   :  { %2148 = vmatmul.mubr.msk.f32.gmra.mrb[18].mxu0 %vm404_vm1, %v737_v20  ;;  %v724_v31 = vadd.f32 1.0, %v2324_v23 }
 0x206   :  { %2150 = vmatprep.mubr.msk.f32.mxu0 %vm404_vm1, %v738_v27  ;;  %v741_v45 = vmul.f32 %v725_v1, %v613_v26 }
 0x207   :  { %v740_v21 = vmul.f32 %v724_v31, %v612_v3 }
 0x209   :  { %2151 = vmatmul.mubr.msk.f32.gmra.mrb[20].mxu0 %vm404_vm1, %v739_v13 }
 0x20a   :  { %2153 = vmatprep.mubr.msk.f32.mxu0 %vm404_vm1, %v740_v21 }
 0x20d   :  { %2154 = vmatmul.mubr.msk.f32.gmra.mrb[22].mxu0 %vm404_vm1, %v741_v45 }
 0x2c1   :  { %v2134_v37 = vpop.f32.mrb[8].mxu0 }
 0x2c2   :  { %v875_v30 = vadd.f32 %v2134_v37, %v2903_v28  ;;  %v869_v38 = vpop.f32.mrb[9].mxu0 }
 0x2c3   :  { %v870_v35 = vadd.f32 %v2903_v28, %v869_v38 }
 0x2c4   :  { %v965_v40 = vmul.f32 0.044715, %v875_v30  ;;  %v949_v20 = vmul.f32 0.5, %v875_v30 }
 0x2c5   :  { %v964_v42 = vmul.f32 0.044715, %v870_v35  ;;  %v2137_v44 = vpop.f32.mrb[10].mxu0  ;;  %v948_v31 = vmul.f32 0.5, %v870_v35 }
 0x2c6   :  { %v981_v41 = vmul.f32 %v965_v40, %v875_v30  ;;  %v885_v47 = vadd.f32 %v2137_v44, %v2903_v28  ;;  %v879_v48 = vpop.f32.mrb[11].mxu0 }
 0x2c7   :  { %v980_v49 = vmul.f32 %v964_v42, %v870_v35  ;;  %v880_v51 = vadd.f32 %v2903_v28, %v879_v48 }
 0x2c8   :  { %v997_v52 = vmul.f32 %v981_v41, %v875_v30  ;;  %v967_v54 = vmul.f32 0.044715, %v885_v47  ;;  %v2913_v13 = vmul.f32 0.5, %v885_v47 }
 0x2c9   :  { %v996_v56 = vmul.f32 %v980_v49, %v870_v35  ;;  %v966_v55 = vmul.f32 0.044715, %v880_v51  ;;  %v2140_v58 = vpop.f32.mrb[12].mxu0  ;;  %v2918_v61 = vmul.f32 0.5, %v880_v51 }
 0x2ca   :  { %v1013_v50 = vadd.f32 %v997_v52, %v875_v30  ;;  %v983_v25 = vmul.f32 %v967_v54, %v885_v47  ;;  %v895_v36 = vadd.f32 %v2140_v58, %v2903_v28  ;;  %v889_v57 = vpop.f32.mrb[13].mxu0  ;;  %v1093_v54 = vld [vmem:[%s3258_s1 + $0x8] sm:$0xff] }
 0x2cb   :  { %v1012_v59 = vadd.f32 %v996_v56, %v870_v35  ;;  %v982_v62 = vmul.f32 %v966_v55, %v880_v51  ;;  %v890_v10 = vadd.f32 %v2903_v28, %v889_v57 }
 0x2cc   :  { %v1029_v0 = vmul.f32 0.7978846, %v1013_v50  ;;  %v999_v63 = vmul.f32 %v983_v25, %v885_v47  ;;  %v969_v53 = vmul.f32 0.044715, %v895_v36  ;;  %v2925_v33 = vmul.f32 0.5, %v895_v36 }
 0x2cd   :  { %v1028_v14 = vmul.f32 0.7978846, %v1012_v59  ;;  %v998_v2 = vmul.f32 %v982_v62, %v880_v51  ;;  %v968_v9 = vmul.f32 0.044715, %v890_v10  ;;  %v2923_v17 = vmul.f32 0.5, %v890_v10  ;;  %v1092_v59 = vld [vmem:[%s3258_s1] sm:$0xff] }
 0x2ce   :  { %2325 = vtanh.f32 %v1029_v0  ;;  %v1015_v4 = vadd.f32 %v999_v63, %v885_v47  ;;  %v985_v5 = vmul.f32 %v969_v53, %v895_v36  ;;  %v2143_v7 = vpop.f32.mrb[14].mxu0 }
 0x2cf   :  { %2327 = vtanh.f32 %v1028_v14  ;;  %v1014_v8 = vadd.f32 %v998_v2, %v880_v51  ;;  %v984_v6 = vmul.f32 %v968_v9, %v890_v10  ;;  %v905_v11 = vadd.f32 %v2143_v7, %v2903_v28  ;;  %v899_v12 = vpop.f32.mrb[15].mxu0 }
 0x2d0   :  { %v1031_v43 = vmul.f32 0.7978846, %v1015_v4  ;;  %v1001_v15 = vmul.f32 %v985_v5, %v895_v36  ;;  %v900_v16 = vadd.f32 %v2903_v28, %v899_v12 }
 0x2d1   :  { %v1030_v29 = vmul.f32 0.7978846, %v1014_v8  ;;  %v1000_v18 = vmul.f32 %v984_v6, %v890_v10  ;;  %v971_v24 = vmul.f32 0.044715, %v905_v11  ;;  %v2928_v30 = vmul.f32 0.5, %v905_v11 }
 0x2d2   :  { %2329 = vtanh.f32 %v1031_v43  ;;  %v1017_v39 = vadd.f32 %v1001_v15, %v895_v36  ;;  %v970_v19 = vmul.f32 0.044715, %v900_v16  ;;  %v2931_v44 = vmul.f32 0.5, %v900_v16 }
 0x2d3   :  { %2331 = vtanh.f32 %v1030_v29  ;;  %v1016_v60 = vadd.f32 %v1000_v18, %v890_v10  ;;  %v987_v23 = vmul.f32 %v971_v24, %v905_v11 }
 0x2d4   :  { %v1033_v27 = vmul.f32 0.7978846, %v1017_v39  ;;  %v986_v46 = vmul.f32 %v970_v19, %v900_v16  ;;  %v2146_v3 = vpop.f32.mrb[16].mxu0 }
 0x2d5   :  { %v1032_v21 = vmul.f32 0.7978846, %v1016_v60  ;;  %v1003_v1 = vmul.f32 %v987_v23, %v905_v11  ;;  %v2916_v26 = vadd.f32 %v2146_v3, %v2903_v28  ;;  %v909_v45 = vpop.f32.mrb[17].mxu0 }
 0x2d6   :  { %v1002_v22 = vmul.f32 %v986_v46, %v900_v16  ;;  %v2921_v32 = vadd.f32 %v2903_v28, %v909_v45  ;;  %2333 = vtanh.f32 %v1033_v27 }
 0x2d7   :  { %v1019_v34 = vadd.f32 %v1003_v1, %v905_v11  ;;  %v973_v37 = vmul.f32 0.044715, %v2916_v26  ;;  %2335 = vtanh.f32 %v1032_v21 }
 0x2d8   :  { %v2326_v38 = vpop.eup %2325  ;;  %v1018_v35 = vadd.f32 %v1002_v22, %v900_v16  ;;  %v972_v40 = vmul.f32 0.044715, %v2921_v32  ;;  %v2149_v42 = vpop.f32.mrb[18].mxu0  ;;  %v1094_v22 = vld [vmem:[%s3258_s1 + $0x10] sm:$0xff] }
 0x2d9   :  { %v2328_v41 = vpop.eup %2327  ;;  %v1061_v47 = vadd.f32 1.0, %v2326_v38  ;;  %v1035_v48 = vmul.f32 0.7978846, %v1019_v34  ;;  %v989_v49 = vmul.f32 %v973_v37, %v2916_v26  ;;  %v2935_v51 = vadd.f32 %v2149_v42, %v2903_v28  ;;  %v919_v52 = vpop.f32.mrb[19].mxu0 }
 0x2da   :  { %v1034_v56 = vmul.f32 0.7978846, %v1018_v35  ;;  %v988_v55 = vmul.f32 %v972_v40, %v2921_v32  ;;  %v2942_v58 = vadd.f32 %v2903_v28, %v919_v52  ;;  %v1060_v50 = vadd.f32 1.0, %v2328_v41  ;;  %v1095_v40 = vld [vmem:[%s3258_s1 + $0x18] sm:$0xff] }
 0x2db   :  { %v1077_v25 = vmul.f32 %v1061_v47, %v949_v20  ;;  %2337 = vtanh.f32 %v1035_v48  ;;  %v1005_v36 = vmul.f32 %v989_v49, %v2916_v26  ;;  %v975_v57 = vmul.f32 0.044715, %v2935_v51 }
 0x2dc   :  { %v2330_v62 = vpop.eup %2329  ;;  %2339 = vtanh.f32 %v1034_v56  ;;  %v1004_v10 = vmul.f32 %v988_v55, %v2921_v32  ;;  %v974_v0 = vmul.f32 0.044715, %v2942_v58  ;;  %v2152_v63 = vpop.f32.mrb[20].mxu0  ;;  %v1076_v53 = vmul.f32 %v1060_v50, %v948_v31 }
 0x2dd   :  { %v2332_v14 = vpop.eup %2331  ;;  %v1109_v2 = vmul.f32 %v1093_v54, %v1077_v25  ;;  %v1021_v9 = vadd.f32 %v1005_v36, %v2916_v26  ;;  %v991_v4 = vmul.f32 %v975_v57, %v2935_v51  ;;  %v2954_v5 = vadd.f32 %v2152_v63, %v2903_v28  ;;  %v929_v7 = vpop.f32.mrb[21].mxu0 }
 0x2de   :  { %v1020_v8 = vadd.f32 %v1004_v10, %v2921_v32  ;;  %v990_v6 = vmul.f32 %v974_v0, %v2942_v58  ;;  %v2959_v11 = vadd.f32 %v2903_v28, %v929_v7  ;;  %v1108_v12 = vmul.f32 %v1092_v59, %v1076_v53  ;;  %v1096_v10 = vld [vmem:[%s3258_s1 + $0x20] sm:$0xff] }
 0x2df   :  { %v1037_v43 = vmul.f32 0.7978846, %v1021_v9  ;;  %v1007_v15 = vmul.f32 %v991_v4, %v2935_v51  ;;  %v977_v16 = vmul.f32 0.044715, %v2954_v5  ;;  %v1062_v29 = vadd.f32 1.0, %v2332_v14  ;;  %v1097_v9 = vld [vmem:[%s3258_s1 + $0x28] sm:$0xff] }
 0x2e0   :  { %v1036_v18 = vmul.f32 0.7978846, %v1020_v8  ;;  %v1006_v24 = vmul.f32 %v990_v6, %v2942_v58  ;;  %v976_v39 = vmul.f32 0.044715, %v2959_v11  ;;  %v2155_v19 = vpop.f32.mrb[22].mxu0  ;;  %2164 = vmatprep.mubr.msk.f32.mxu1 %vm404_vm1, %v1108_v12  ;;  %v1063_v20 = vadd.f32 1.0, %v2330_v62  ;;  %v2334_v60 = vpop.eup %2333 }
 0x2e1   :  { %2341 = vtanh.f32 %v1037_v43  ;;  %v1023_v23 = vadd.f32 %v1007_v15, %v2935_v51  ;;  %v993_v27 = vmul.f32 %v977_v16, %v2954_v5  ;;  %v2969_v46 = vadd.f32 %v2155_v19, %v2903_v28  ;;  %v939_v3 = vpop.f32.mrb[23].mxu0  ;;  %2165 = vmatmul.mubr.msk.f32.vlgmr.msra.gmra.mrb[24].mxu1 %vm404_vm1, %v1109_v2  ;;  %v2336_v31 = vpop.eup %2335  ;;  %v1098_v4 = vld [vmem:[%s3258_s1 + $0x30] sm:$0xff] }
 0x2e2   :  { %2343 = vtanh.f32 %v1036_v18  ;;  %v1022_v21 = vadd.f32 %v1006_v24, %v2942_v58  ;;  %v992_v1 = vmul.f32 %v976_v39, %v2959_v11  ;;  %v2975_v45 = vadd.f32 %v2903_v28, %v939_v3  ;;  %v1099_v24 = vld [vmem:[%s3258_s1 + $0x38] sm:$0xff] }
 0x2e3   :  { %v1039_v34 = vmul.f32 0.7978846, %v1023_v23  ;;  %v1009_v37 = vmul.f32 %v993_v27, %v2954_v5  ;;  %v979_v38 = vmul.f32 0.044715, %v2969_v46  ;;  %v1078_v35 = vmul.f32 %v1062_v29, %v2918_v61 }
 0x2e4   :  { %v1038_v42 = vmul.f32 0.7978846, %v1022_v21  ;;  %v1008_v41 = vmul.f32 %v992_v1, %v2959_v11  ;;  %v978_v28 = vmul.f32 0.044715, %v2975_v45  ;;  %v1079_v47 = vmul.f32 %v1063_v20, %v2913_v13 }
 0x2e5   :  { %v2338_v48 = vpop.eup %2337  ;;  %2345 = vtanh.f32 %v1039_v34  ;;  %v1025_v49 = vadd.f32 %v1009_v37, %v2954_v5  ;;  %v995_v52 = vmul.f32 %v979_v38, %v2969_v46  ;;  %v1110_v54 = vmul.f32 %v1094_v22, %v1078_v35 }
 0x2e6   :  { %v2340_v56 = vpop.eup %2339  ;;  %2347 = vtanh.f32 %v1038_v42  ;;  %v1024_v61 = vadd.f32 %v1008_v41, %v2959_v11  ;;  %v994_v55 = vmul.f32 %v978_v28, %v2975_v45  ;;  %v1111_v50 = vmul.f32 %v1095_v40, %v1079_v47 }
 0x2e7   :  { %v1041_v25 = vmul.f32 0.7978846, %v1025_v49  ;;  %v1011_v36 = vmul.f32 %v995_v52, %v2969_v46  ;;  %2167 = vmatprep.mubr.msk.f32.mxu1 %vm404_vm1, %v1110_v54  ;;  %v1064_v13 = vadd.f32 1.0, %v2336_v31  ;;  %v1065_v57 = vadd.f32 1.0, %v2334_v60 }
 0x2e8   :  { %v1040_v59 = vmul.f32 0.7978846, %v1024_v61  ;;  %v1010_v62 = vmul.f32 %v994_v55, %v2975_v45  ;;  %2168 = vmatmul.mubr.msk.f32.gmra.mrb[26].mxu1 %vm404_vm1, %v1111_v50  ;;  %v1066_v0 = vadd.f32 1.0, %v2340_v56  ;;  %v1067_v63 = vadd.f32 1.0, %v2338_v48 }
 0x2e9   :  { %2349 = vtanh.f32 %v1041_v25  ;;  %v1027_v53 = vadd.f32 %v1011_v36, %v2969_v46  ;;  %v1080_v14 = vmul.f32 %v1064_v13, %v2923_v17  ;;  %v1081_v2 = vmul.f32 %v1065_v57, %v2925_v33 }
 0x2ea   :  { %2351 = vtanh.f32 %v1040_v59  ;;  %v1026_v7 = vadd.f32 %v1010_v62, %v2975_v45  ;;  %v1082_v8 = vmul.f32 %v1066_v0, %v2931_v44  ;;  %v1083_v17 = vmul.f32 %v1067_v63, %v2928_v30  ;;  %v1100_v30 = vld [vmem:[%s3258_s1 + $0x40] sm:$0xff]  ;;  %v1107_v63 = vld [vmem:[%s3258_s1 + $0x78] sm:$0xff] }
 0x2eb   :  { %v2342_v6 = vpop.eup %2341  ;;  %v1043_v12 = vmul.f32 0.7978846, %v1027_v53  ;;  %v1112_v43 = vmul.f32 %v1096_v10, %v1080_v14  ;;  %v1113_v16 = vmul.f32 %v1097_v9, %v1081_v2  ;;  %v956_v39 = vmul.f32 0.5, %v2921_v32  ;;  %v1101_v32 = vld [vmem:[%s3258_s1 + $0x48] sm:$0xff]  ;;  %v1510_v53 = vld [vmem:[%s3263_s6 + $0x18] sm:$0xff] }
 0x2ec   :  { %v2344_v15 = vpop.eup %2343  ;;  %v1042_v33 = vmul.f32 0.7978846, %v1026_v7  ;;  %v1114_v29 = vmul.f32 %v1098_v4, %v1082_v8  ;;  %v1069_v18 = vadd.f32 1.0, %v2342_v6  ;;  %v957_v19 = vmul.f32 0.5, %v2916_v26  ;;  %v1102_v26 = vld [vmem:[%s3258_s1 + $0x50] sm:$0xff] }
 0x2ed   :  { %2353 = vtanh.f32 %v1043_v12  ;;  %2170 = vmatprep.mubr.msk.f32.mxu1 %vm404_vm1, %v1112_v43  ;;  %v1068_v44 = vadd.f32 1.0, %v2344_v15  ;;  %v1115_v27 = vmul.f32 %v1099_v24, %v1083_v17  ;;  %v958_v1 = vmul.f32 0.5, %v2942_v58  ;;  %v1103_v58 = vld [vmem:[%s3258_s1 + $0x58] sm:$0xff]  ;;  %v3068_v2 = vld [vmem:[%s3262_s5 + $0x2] ss:$0 sm:$0xff] }
 0x2ee   :  { %2355 = vtanh.f32 %v1042_v33  ;;  %2171 = vmatmul.mubr.msk.f32.gmra.mrb[28].mxu1 %vm404_vm1, %v1113_v16  ;;  %v1085_v3 = vmul.f32 %v1069_v18, %v957_v19  ;;  %v959_v34 = vmul.f32 0.5, %v2935_v51  ;;  %v960_v47 = vmul.f32 0.5, %v2959_v11  ;;  %v1104_v51 = vld [vmem:[%s3258_s1 + $0x60] sm:$0xff]  ;;  %v1105_v11 = vld [vmem:[%s3258_s1 + $0x68] sm:$0xff] }
 0x2ef   :  { %v2346_v20 = vpop.eup %2345  ;;  %2173 = vmatprep.mubr.msk.f32.mxu1 %vm404_vm1, %v1114_v29  ;;  %v1084_v60 = vmul.f32 %v1068_v44, %v956_v39  ;;  %v961_v49 = vmul.f32 0.5, %v2954_v5  ;;  %v962_v36 = vmul.f32 0.5, %v2975_v45  ;;  %v1106_v5 = vld [vmem:[%s3258_s1 + $0x70] sm:$0xff]  ;;  %v963_v57 = vmul.f32 0.5, %v2969_v46 }
 0x2f0   :  { %v2348_v23 = vpop.eup %2347  ;;  %v1071_v31 = vadd.f32 1.0, %v2346_v20  ;;  %v1117_v40 = vmul.f32 %v1101_v32, %v1085_v3  ;;  %v1509_v46 = vld [vmem:[%s3263_s6 + $0x10] sm:$0xff] }
 0x2f1   :  { %v1116_v21 = vmul.f32 %v1100_v30, %v1084_v60  ;;  %v1070_v22 = vadd.f32 1.0, %v2348_v23  ;;  %v2252_v14 = vpack.c.bf16 %v1510_v53, %v1509_v46 }
 0x2f2   :  { %2174 = vmatmul.mubr.msk.f32.gmra.mrb[30].mxu1 %vm404_vm1, %v1115_v27  ;;  %v1087_v42 = vmul.f32 %v1071_v31, %v959_v34 }
 0x2f3   :  { %v2350_v37 = vpop.eup %2349  ;;  %2176 = vmatprep.mubr.msk.f32.mxu1 %vm404_vm1, %v1116_v21  ;;  %v1086_v38 = vmul.f32 %v1070_v22, %v958_v1  ;;  %2253 = vmatprep.subr.bf16.mxu0 %v2252_v14 }
 0x2f4   :  { %v2352_v35 = vpop.eup %2351  ;;  %v1073_v41 = vadd.f32 1.0, %v2350_v37  ;;  %v1119_v61 = vmul.f32 %v1103_v58, %v1087_v42  ;;  %2255 = vmatpush3.bf16.msra.mxu0 %v2252_v14 }
 0x2f5   :  { %v1118_v28 = vmul.f32 %v1102_v26, %v1086_v38  ;;  %v1072_v48 = vadd.f32 1.0, %v2352_v35 }
 0x2f6   :  { %2177 = vmatmul.mubr.msk.f32.gmra.mrb[32].mxu1 %vm404_vm1, %v1117_v40  ;;  %v1089_v55 = vmul.f32 %v1073_v41, %v961_v49 }
 0x2f7   :  { %v2354_v52 = vpop.eup %2353  ;;  %2179 = vmatprep.mubr.msk.f32.mxu1 %vm404_vm1, %v1118_v28  ;;  %v1088_v54 = vmul.f32 %v1072_v48, %v960_v47 }
 0x2f8   :  { %v2356_v56 = vpop.eup %2355  ;;  %v1075_v50 = vadd.f32 1.0, %v2354_v52  ;;  %v1121_v62 = vmul.f32 %v1105_v11, %v1089_v55 }
 0x2f9   :  { %v1120_v25 = vmul.f32 %v1104_v51, %v1088_v54  ;;  %v1074_v13 = vadd.f32 1.0, %v2356_v56 }
 0x2fa   :  { %2180 = vmatmul.mubr.msk.f32.gmra.mrb[34].mxu1 %vm404_vm1, %v1119_v61  ;;  %v1091_v10 = vmul.f32 %v1075_v50, %v963_v57 }
 0x2fb   :  { %2182 = vmatprep.mubr.msk.f32.mxu1 %vm404_vm1, %v1120_v25  ;;  %v1090_v59 = vmul.f32 %v1074_v13, %v962_v36 }
 0x2fc   :  { %v1123_v45 = vmul.f32 %v1107_v63, %v1091_v10 }
 0x2fd   :  { %v1122_v0 = vmul.f32 %v1106_v5, %v1090_v59 }
 0x2fe   :  { %2183 = vmatmul.mubr.msk.f32.gmra.mrb[36].mxu1 %vm404_vm1, %v1121_v62 }
 0x2ff   :  { %2185 = vmatprep.mubr.msk.f32.mxu1 %vm404_vm1, %v1122_v0 }
 0x302   :  { %2186 = vmatmul.mubr.msk.f32.gmra.mrb[38].mxu1 %vm404_vm1, %v1123_v45 }
 0x3b4   :  { %v2166_v9 = vpop.f32.mrb[24].mxu1 }
 0x3b5   :  { %v1257_v4 = vadd.f32 %v2166_v9, %v3068_v2  ;;  %v1251_v7 = vpop.f32.mrb[25].mxu1  ;;  %v1918_v9 = vld [vmem:[%s3258_s1 + $0x88] sm:$0xff] }
 0x3b6   :  { %v1252_v8 = vadd.f32 %v3068_v2, %v1251_v7 }
 0x3b7   :  { %v1347_v6 = vmul.f32 0.044715, %v1257_v4  ;;  %v1331_v37 = vmul.f32 0.5, %v1257_v4 }
 0x3b8   :  { %v1346_v12 = vmul.f32 0.044715, %v1252_v8  ;;  %v1330_v42 = vmul.f32 0.5, %v1252_v8 }
 0x3b9   :  { %v1363_v43 = vmul.f32 %v1347_v6, %v1257_v4 }
 0x3ba   :  { %v1362_v17 = vmul.f32 %v1346_v12, %v1252_v8 }
 0x3bb   :  { %v1379_v15 = vmul.f32 %v1363_v43, %v1257_v4  ;;  %v2169_v33 = vpop.f32.mrb[26].mxu1 }
 0x3bc   :  { %v1378_v16 = vmul.f32 %v1362_v17, %v1252_v8  ;;  %v1267_v29 = vadd.f32 %v2169_v33, %v3068_v2  ;;  %v1261_v18 = vpop.f32.mrb[27].mxu1 }
 0x3bd   :  { %v1395_v24 = vadd.f32 %v1379_v15, %v1257_v4  ;;  %v1262_v39 = vadd.f32 %v3068_v2, %v1261_v18 }
 0x3be   :  { %v1394_v44 = vadd.f32 %v1378_v16, %v1252_v8  ;;  %v1349_v30 = vmul.f32 0.044715, %v1267_v29  ;;  %v3077_v48 = vmul.f32 0.5, %v1267_v29 }
 0x3bf   :  { %v1411_v19 = vmul.f32 0.7978846, %v1395_v24  ;;  %v1348_v20 = vmul.f32 0.044715, %v1262_v39  ;;  %v3080_v54 = vmul.f32 0.5, %v1262_v39 }
 0x3c0   :  { %v1410_v60 = vmul.f32 0.7978846, %v1394_v44  ;;  %v1365_v23 = vmul.f32 %v1349_v30, %v1267_v29 }
 0x3c1   :  { %2357 = vtanh.f32 %v1411_v19  ;;  %v1364_v27 = vmul.f32 %v1348_v20, %v1262_v39  ;;  %v2172_v3 = vpop.f32.mrb[28].mxu1 }
 0x3c2   :  { %2359 = vtanh.f32 %v1410_v60  ;;  %v1381_v31 = vmul.f32 %v1365_v23, %v1267_v29  ;;  %v1277_v21 = vadd.f32 %v2172_v3, %v3068_v2  ;;  %v1271_v32 = vpop.f32.mrb[29].mxu1 }
 0x3c3   :  { %v1380_v1 = vmul.f32 %v1364_v27, %v1262_v39  ;;  %v1272_v22 = vadd.f32 %v3068_v2, %v1271_v32  ;;  %v1917_v32 = vld [vmem:[%s3258_s1 + $0x80] sm:$0xff] }
 0x3c4   :  { %v1397_v26 = vadd.f32 %v1381_v31, %v1267_v29  ;;  %v1351_v34 = vmul.f32 0.044715, %v1277_v21  ;;  %v3082_v55 = vmul.f32 0.5, %v1277_v21 }
 0x3c5   :  { %v1396_v38 = vadd.f32 %v1380_v1, %v1262_v39  ;;  %v1350_v35 = vmul.f32 0.044715, %v1272_v22  ;;  %v2175_v40 = vpop.f32.mrb[30].mxu1  ;;  %v3084_v36 = vmul.f32 0.5, %v1272_v22 }
 0x3c6   :  { %v1413_v41 = vmul.f32 0.7978846, %v1397_v26  ;;  %v1367_v28 = vmul.f32 %v1351_v34, %v1277_v21  ;;  %v1287_v58 = vadd.f32 %v2175_v40, %v3068_v2  ;;  %v1281_v47 = vpop.f32.mrb[31].mxu1 }
 0x3c7   :  { %v1412_v51 = vmul.f32 0.7978846, %v1396_v38  ;;  %v1366_v49 = vmul.f32 %v1350_v35, %v1272_v22  ;;  %v1282_v52 = vadd.f32 %v3068_v2, %v1281_v47 }
 0x3c8   :  { %2361 = vtanh.f32 %v1413_v41  ;;  %v1383_v56 = vmul.f32 %v1367_v28, %v1277_v21  ;;  %v1353_v61 = vmul.f32 0.044715, %v1287_v58  ;;  %v3089_v62 = vmul.f32 0.5, %v1287_v58 }
 0x3c9   :  { %2363 = vtanh.f32 %v1412_v51  ;;  %v1382_v50 = vmul.f32 %v1366_v49, %v1272_v22  ;;  %v1352_v25 = vmul.f32 0.044715, %v1282_v52  ;;  %v2178_v11 = vpop.f32.mrb[32].mxu1  ;;  %v3094_v46 = vmul.f32 0.5, %v1282_v52 }
 0x3ca   :  { %v1399_v13 = vadd.f32 %v1383_v56, %v1277_v21  ;;  %v1369_v5 = vmul.f32 %v1353_v61, %v1287_v58  ;;  %v3087_v57 = vadd.f32 %v2178_v11, %v3068_v2  ;;  %v1291_v59 = vpop.f32.mrb[33].mxu1 }
 0x3cb   :  { %v2358_v10 = vpop.eup %2357  ;;  %v1398_v0 = vadd.f32 %v1382_v50, %v1272_v22  ;;  %v1368_v63 = vmul.f32 %v1352_v25, %v1282_v52  ;;  %v3092_v45 = vadd.f32 %v3068_v2, %v1291_v59 }
 0x3cc   :  { %v2360_v53 = vpop.eup %2359  ;;  %v1443_v14 = vadd.f32 1.0, %v2358_v10  ;;  %v1415_v4 = vmul.f32 0.7978846, %v1399_v13  ;;  %v1385_v7 = vmul.f32 %v1369_v5, %v1287_v58  ;;  %v1355_v8 = vmul.f32 0.044715, %v3087_v57 }
 0x3cd   :  { %v1414_v6 = vmul.f32 0.7978846, %v1398_v0  ;;  %v1384_v12 = vmul.f32 %v1368_v63, %v1282_v52  ;;  %v1354_v43 = vmul.f32 0.044715, %v3092_v45  ;;  %v2181_v17 = vpop.f32.mrb[34].mxu1  ;;  %v1442_v15 = vadd.f32 1.0, %v2360_v53 }
 0x3ce   :  { %v1459_v33 = vmul.f32 %v1443_v14, %v1331_v37  ;;  %2365 = vtanh.f32 %v1415_v4  ;;  %v1401_v16 = vadd.f32 %v1385_v7, %v1287_v58  ;;  %v1371_v29 = vmul.f32 %v1355_v8, %v3087_v57  ;;  %v1301_v18 = vpop.f32.mrb[35].mxu1  ;;  %v1919_v0 = vld [vmem:[%s3258_s1 + $0x90] sm:$0xff] }
 0x3cf   :  { %2367 = vtanh.f32 %v1414_v6  ;;  %v1400_v24 = vadd.f32 %v1384_v12, %v1282_v52  ;;  %v1370_v39 = vmul.f32 %v1354_v43, %v3092_v45  ;;  %v3104_v44 = vadd.f32 %v2181_v17, %v3068_v2 }
 0x3d0   :  { %v1492_v30 = vmul.f32 %v1918_v9, %v1459_v33  ;;  %v1417_v19 = vmul.f32 0.7978846, %v1401_v16  ;;  %v1387_v20 = vmul.f32 %v1371_v29, %v3087_v57  ;;  %v3108_v60 = vadd.f32 %v3068_v2, %v1301_v18  ;;  %v1920_v16 = vld [vmem:[%s3258_s1 + $0x98] sm:$0xff] }
 0x3d1   :  { %v1416_v23 = vmul.f32 0.7978846, %v1400_v24  ;;  %v1386_v27 = vmul.f32 %v1370_v39, %v3092_v45  ;;  %v1357_v3 = vmul.f32 0.044715, %v3104_v44  ;;  %v2184_v31 = vpop.f32.mrb[36].mxu1  ;;  %v1458_v21 = vmul.f32 %v1442_v15, %v1330_v42 }
 0x3d2   :  { %v2362_v1 = vpop.eup %2361  ;;  %2369 = vtanh.f32 %v1417_v19  ;;  %v1403_v22 = vadd.f32 %v1387_v20, %v3087_v57  ;;  %v1356_v26 = vmul.f32 0.044715, %v3108_v60  ;;  %v3118_v34 = vadd.f32 %v2184_v31, %v3068_v2  ;;  %v1311_v37 = vpop.f32.mrb[37].mxu1  ;;  %v1921_v31 = vld [vmem:[%s3258_s1 + $0xa0] sm:$0xff] }
 0x3d3   :  { %v2364_v38 = vpop.eup %2363  ;;  %2371 = vtanh.f32 %v1416_v23  ;;  %v1402_v35 = vadd.f32 %v1386_v27, %v3092_v45  ;;  %v1373_v40 = vmul.f32 %v1357_v3, %v3104_v44  ;;  %v3123_v42 = vadd.f32 %v3068_v2, %v1311_v37 }
 0x3d4   :  { %v1419_v41 = vmul.f32 0.7978846, %v1403_v22  ;;  %v1372_v28 = vmul.f32 %v1356_v26, %v3108_v60  ;;  %v1359_v58 = vmul.f32 0.044715, %v3118_v34  ;;  %v1491_v47 = vmul.f32 %v1917_v32, %v1458_v21 }
 0x3d5   :  { %v1418_v51 = vmul.f32 0.7978846, %v1402_v35  ;;  %v1389_v49 = vmul.f32 %v1373_v40, %v3104_v44  ;;  %v1358_v52 = vmul.f32 0.044715, %v3123_v42  ;;  %v2187_v56 = vpop.f32.mrb[38].mxu1  ;;  %v1444_v61 = vadd.f32 1.0, %v2364_v38 }
 0x3d6   :  { %2373 = vtanh.f32 %v1419_v41  ;;  %v1388_v50 = vmul.f32 %v1372_v28, %v3108_v60  ;;  %v1375_v25 = vmul.f32 %v1359_v58, %v3118_v34  ;;  %v3132_v11 = vadd.f32 %v2187_v56, %v3068_v2  ;;  %v1321_v13 = vpop.f32.mrb[39].mxu1  ;;  %2196 = vmatprep.mubr.msk.f32.mxu0 %vm404_vm1, %v1491_v47  ;;  %v1923_v38 = vld [vmem:[%s3258_s1 + $0xb0] sm:$0xff]  ;;  %v1924_v56 = vld [vmem:[%s3258_s1 + $0xb8] sm:$0xff] }
 0x3d7   :  { %2375 = vtanh.f32 %v1418_v51  ;;  %v1405_v5 = vadd.f32 %v1389_v49, %v3104_v44  ;;  %v1374_v59 = vmul.f32 %v1358_v52, %v3123_v42  ;;  %v3138_v10 = vadd.f32 %v3068_v2, %v1321_v13  ;;  %2197 = vmatmul.mubr.msk.f32.vlgmr.msra.gmra.mrb[24].mxu0 %vm404_vm1, %v1492_v30 }
 0x3d8   :  { %v2366_v63 = vpop.eup %2365  ;;  %v1404_v53 = vadd.f32 %v1388_v50, %v3108_v60  ;;  %v1391_v14 = vmul.f32 %v1375_v25, %v3118_v34  ;;  %v1361_v9 = vmul.f32 0.044715, %v3132_v11  ;;  %v1460_v4 = vmul.f32 %v1444_v61, %v3080_v54 }
 0x3d9   :  { %v2368_v7 = vpop.eup %2367  ;;  %v1421_v8 = vmul.f32 0.7978846, %v1405_v5  ;;  %v1390_v2 = vmul.f32 %v1374_v59, %v3123_v42  ;;  %v1360_v6 = vmul.f32 0.044715, %v3138_v10  ;;  %v1445_v12 = vadd.f32 1.0, %v2362_v1  ;;  %v1922_v1 = vld [vmem:[%s3258_s1 + $0xa8] sm:$0xff] }
 0x3da   :  { %v1420_v43 = vmul.f32 0.7978846, %v1404_v53  ;;  %v1407_v17 = vadd.f32 %v1391_v14, %v3118_v34  ;;  %v1377_v15 = vmul.f32 %v1361_v9, %v3132_v11  ;;  %v1493_v33 = vmul.f32 %v1919_v0, %v1460_v4 }
 0x3db   :  { %2377 = vtanh.f32 %v1421_v8  ;;  %v1406_v54 = vadd.f32 %v1390_v2, %v3123_v42  ;;  %v1376_v29 = vmul.f32 %v1360_v6, %v3138_v10  ;;  %v1461_v18 = vmul.f32 %v1445_v12, %v3077_v48 }
 0x3dc   :  { %v2370_v24 = vpop.eup %2369  ;;  %2379 = vtanh.f32 %v1420_v43  ;;  %v1423_v39 = vmul.f32 0.7978846, %v1407_v17  ;;  %v1393_v30 = vmul.f32 %v1377_v15, %v3132_v11  ;;  %2199 = vmatprep.mubr.msk.f32.mxu0 %vm404_vm1, %v1493_v33  ;;  %v1446_v19 = vadd.f32 1.0, %v2368_v7  ;;  %v1927_v7 = vld [vmem:[%s3258_s1 + $0xd0] sm:$0xff]  ;;  %v1928_v17 = vld [vmem:[%s3258_s1 + $0xd8] sm:$0xff]  ;;  %v1929_v33 = vld [vmem:[%s3258_s1 + $0xe0] sm:$0xff] }
 0x3dd   :  { %v2372_v20 = vpop.eup %2371  ;;  %v1422_v23 = vmul.f32 0.7978846, %v1406_v54  ;;  %v1392_v27 = vmul.f32 %v1376_v29, %v3138_v10  ;;  %v1494_v3 = vmul.f32 %v1920_v16, %v1461_v18  ;;  %v1447_v21 = vadd.f32 1.0, %v2366_v63  ;;  %v1926_v63 = vld [vmem:[%s3258_s1 + $0xc8] sm:$0xff] }
 0x3de   :  { %2381 = vtanh.f32 %v1423_v39  ;;  %v1409_v48 = vadd.f32 %v1393_v30, %v3132_v11  ;;  %v1462_v32 = vmul.f32 %v1446_v19, %v3084_v36  ;;  %v1448_v22 = vadd.f32 1.0, %v2372_v20 }
 0x3df   :  { %2383 = vtanh.f32 %v1422_v23  ;;  %v1408_v26 = vadd.f32 %v1392_v27, %v3138_v10  ;;  %2200 = vmatmul.mubr.msk.f32.gmra.mrb[26].mxu0 %vm404_vm1, %v1494_v3  ;;  %v1463_v37 = vmul.f32 %v1447_v21, %v3082_v55  ;;  %v1449_v35 = vadd.f32 1.0, %v2370_v24 }
 0x3e0   :  { %v2374_v40 = vpop.eup %2373  ;;  %v1425_v41 = vmul.f32 0.7978846, %v1409_v48  ;;  %v1495_v36 = vmul.f32 %v1921_v31, %v1462_v32  ;;  %v1464_v28 = vmul.f32 %v1448_v22, %v3094_v46  ;;  %v1338_v52 = vmul.f32 0.5, %v3092_v45  ;;  %v1925_v46 = vld [vmem:[%s3258_s1 + $0xc0] sm:$0xff]  ;;  %v1932_v32 = vld [vmem:[%s3258_s1 + $0xf8] sm:$0xff] }
 0x3e1   :  { %v2376_v58 = vpop.eup %2375  ;;  %v1424_v47 = vmul.f32 0.7978846, %v1408_v26  ;;  %v1496_v51 = vmul.f32 %v1922_v1, %v1463_v37  ;;  %v1465_v49 = vmul.f32 %v1449_v35, %v3089_v62  ;;  %v1451_v50 = vadd.f32 1.0, %v2374_v40 }
 0x3e2   :  { %2385 = vtanh.f32 %v1425_v41  ;;  %2202 = vmatprep.mubr.msk.f32.mxu0 %vm404_vm1, %v1495_v36  ;;  %v1497_v55 = vmul.f32 %v1923_v38, %v1464_v28  ;;  %v1450_v61 = vadd.f32 1.0, %v2376_v58  ;;  %v1339_v62 = vmul.f32 0.5, %v3087_v57 }
 0x3e3   :  { %2387 = vtanh.f32 %v1424_v47  ;;  %2203 = vmatmul.mubr.msk.f32.gmra.mrb[28].mxu0 %vm404_vm1, %v1496_v51  ;;  %v1498_v13 = vmul.f32 %v1924_v56, %v1465_v49  ;;  %v1340_v14 = vmul.f32 0.5, %v3108_v60  ;;  %v1341_v57 = vmul.f32 0.5, %v3104_v44 }
 0x3e4   :  { %2205 = vmatprep.mubr.msk.f32.mxu0 %vm404_vm1, %v1497_v55  ;;  %v1466_v45 = vmul.f32 %v1450_v61, %v1338_v52  ;;  %v1467_v5 = vmul.f32 %v1451_v50, %v1339_v62  ;;  %v1342_v60 = vmul.f32 0.5, %v3123_v42  ;;  %v1343_v16 = vmul.f32 0.5, %v3118_v34  ;;  %v1930_v42 = vld [vmem:[%s3258_s1 + $0xe8] sm:$0xff]  ;;  %v1931_v34 = vld [vmem:[%s3258_s1 + $0xf0] sm:$0xff]  ;;  %s2477_s1 = smov [#allocation2]  }
 0x3e5   :  { %v2378_v25 = vpop.eup %2377  ;;  %v1344_v20 = vmul.f32 0.5, %v3138_v10  ;;  %v1345_v27 = vmul.f32 0.5, %v3132_v11  ;;  %v3227_v11 = vld [vmem:[%s3264_s7] ss:$0 sm:$0xff]  ;;  %s1828_s7 = sshll.u32 %s2477_s1, 4  ;;  %s1829_s7 = int_to_ptr.vmem [resolvable:$true] %s1828_s7 }
 0x3e6   :  { %v2380_v59 = vpop.eup %2379  ;;  %v1499_v0 = vmul.f32 %v1925_v46, %v1466_v45  ;;  %v1453_v53 = vadd.f32 1.0, %v2378_v25  ;;  %v1500_v2 = vmul.f32 %v1926_v63, %v1467_v5  ;;  %s2453_s16 = scalar_lea.vmem %s1829_s7, 2048  ;;  %p2458_p1 = scmp.lt.s32.totalorder %s1829_s7, %s1829_s7 }
 0x3e7   :  { %2206 = vmatmul.mubr.msk.f32.gmra.mrb[30].mxu0 %vm404_vm1, %v1498_v13  ;;  %v1452_v9 = vadd.f32 1.0, %v2380_v59  ;;  %p2454_p0 = scmp.ne.s32.totalorder %s1829_s7, %s2453_s16  ;;  %p2459_p2 = scmp.lt.s32.totalorder %s2453_s16, %s2453_s16 }
 0x3e8   :  { %v2382_v4 = vpop.eup %2381  ;;  %2208 = vmatprep.mubr.msk.f32.mxu0 %vm404_vm1, %v1499_v0  ;;  %v1469_v12 = vmul.f32 %v1453_v53, %v1341_v57 }
 0x3e9   :  { %v2384_v8 = vpop.eup %2383  ;;  %v1468_v6 = vmul.f32 %v1452_v9, %v1340_v14  ;;  %v1455_v43 = vadd.f32 1.0, %v2382_v4  ;;  %p2460_p3 = por %p2459_p2, %p2458_p1 }
 0x3ea   :  { %v1454_v15 = vadd.f32 1.0, %v2384_v8  ;;  %v1502_v24 = vmul.f32 %v1928_v17, %v1469_v12 }
 0x3eb   :  { %2209 = vmatmul.mubr.msk.f32.gmra.mrb[32].mxu0 %vm404_vm1, %v1500_v2  ;;  %v1501_v44 = vmul.f32 %v1927_v7, %v1468_v6  ;;  %v1471_v39 = vmul.f32 %v1455_v43, %v1343_v16  ;;  %p2461_p4 = pnand %p2460_p3, %p2454_p0 }
 0x3ec   :  { %v2386_v54 = vpop.eup %2385  ;;  %v1470_v29 = vmul.f32 %v1454_v15, %v1342_v60 }
 0x3ed   :  { %v2388_v18 = vpop.eup %2387  ;;  %2211 = vmatprep.mubr.msk.f32.mxu0 %vm404_vm1, %v1501_v44  ;;  %v1457_v30 = vadd.f32 1.0, %v2386_v54  ;;  %v1504_v31 = vmul.f32 %v1930_v42, %v1471_v39 }
 0x3ee   :  { %v1503_v19 = vmul.f32 %v1929_v33, %v1470_v29  ;;  %v1456_v23 = vadd.f32 1.0, %v2388_v18 }
 0x3ef   :  { %2212 = vmatmul.mubr.msk.f32.gmra.mrb[34].mxu0 %vm404_vm1, %v1502_v24  ;;  %v1473_v21 = vmul.f32 %v1457_v30, %v1345_v27 }
 0x3f0   :  { %2214 = vmatprep.mubr.msk.f32.mxu0 %vm404_vm1, %v1503_v19  ;;  %v1472_v3 = vmul.f32 %v1456_v23, %v1344_v20 }
 0x3f1   :  { %v1506_v10 = vmul.f32 %v1932_v32, %v1473_v21 }
 0x3f2   :  { %v1505_v48 = vmul.f32 %v1931_v34, %v1472_v3 }
 0x3f3   :  { %2215 = vmatmul.mubr.msk.f32.gmra.mrb[36].mxu0 %vm404_vm1, %v1504_v31 }
 0x3f4   :  { %2217 = vmatprep.mubr.msk.f32.mxu0 %vm404_vm1, %v1505_v48 }
 0x3f7   :  { %2218 = vmatmul.mubr.msk.f32.gmra.mrb[38].mxu0 %vm404_vm1, %v1506_v10 }
 0x4aa   :  { %v2198_v1 = vpop.f32.mrb[24].mxu0 }
 0x4ab   :  { %v1638_v22 = vadd.f32 %v2198_v1, %v3227_v11  ;;  %v1632_v26 = vpop.f32.mrb[25].mxu0 }
 0x4ac   :  { %v1633_v37 = vadd.f32 %v3227_v11, %v1632_v26 }
 0x4ad   :  { %v1951_v38 = vmul.f32 -1.442695, %v1638_v22 }
 0x4ae   :  { %v1950_v35 = vmul.f32 -1.442695, %v1633_v37 }
 0x4af   :  { %2389 = vpow2.f32 %v1951_v38 }
 0x4b0   :  { %2391 = vpow2.f32 %v1950_v35 }
 0x4b2   :  { %v2201_v40 = vpop.f32.mrb[26].mxu0 }
 0x4b3   :  { %v1648_v41 = vadd.f32 %v2201_v40, %v3227_v11  ;;  %v1642_v36 = vpop.f32.mrb[27].mxu0 }
 0x4b4   :  { %v1643_v28 = vadd.f32 %v3227_v11, %v1642_v36 }
 0x4b5   :  { %v1953_v58 = vmul.f32 -1.442695, %v1648_v41 }
 0x4b6   :  { %v1952_v47 = vmul.f32 -1.442695, %v1643_v28  ;;  %v2204_v51 = vpop.f32.mrb[28].mxu0 }
 0x4b7   :  { %2393 = vpow2.f32 %v1953_v58  ;;  %v1658_v49 = vadd.f32 %v2204_v51, %v3227_v11  ;;  %v1652_v52 = vpop.f32.mrb[29].mxu0 }
 0x4b8   :  { %2395 = vpow2.f32 %v1952_v47  ;;  %v1653_v55 = vadd.f32 %v3227_v11, %v1652_v52 }
 0x4b9   :  { %v2390_v56 = vpop.eup %2389  ;;  %v1955_v61 = vmul.f32 -1.442695, %v1658_v49 }
 0x4ba   :  { %v2392_v50 = vpop.eup %2391  ;;  %v1760_v46 = vadd.f32 1.0, %v2390_v56  ;;  %v1954_v62 = vmul.f32 -1.442695, %v1653_v55  ;;  %v2207_v45 = vpop.f32.mrb[30].mxu0 }
 0x4bb   :  { %v1759_v25 = vadd.f32 1.0, %v2392_v50  ;;  %2397 = vpow2.f32 %v1955_v61  ;;  %v1668_v13 = vadd.f32 %v2207_v45, %v3227_v11  ;;  %v1662_v5 = vpop.f32.mrb[31].mxu0 }
 0x4bc   :  { %2399 = vrcp.f32 %v1760_v46  ;;  %v1663_v59 = vadd.f32 %v3227_v11, %v1662_v5 }
 0x4bd   :  { %2401 = vrcp.f32 %v1759_v25  ;;  %v1957_v0 = vmul.f32 -1.442695, %v1668_v13 }
 0x4be   :  { %2403 = vpow2.f32 %v1954_v62  ;;  %v1956_v63 = vmul.f32 -1.442695, %v1663_v59  ;;  %v2210_v53 = vpop.f32.mrb[32].mxu0 }
 0x4bf   :  { %2405 = vpow2.f32 %v1957_v0  ;;  %v1678_v14 = vadd.f32 %v2210_v53, %v3227_v11  ;;  %v1672_v9 = vpop.f32.mrb[33].mxu0 }
 0x4c0   :  { %2407 = vpow2.f32 %v1956_v63  ;;  %v1673_v57 = vadd.f32 %v3227_v11, %v1672_v9 }
 0x4c1   :  { %v2394_v4 = vpop.eup %2393  ;;  %v1959_v7 = vmul.f32 -1.442695, %v1678_v14 }
 0x4c2   :  { %v2396_v8 = vpop.eup %2395  ;;  %v1762_v2 = vadd.f32 1.0, %v2394_v4  ;;  %v1958_v6 = vmul.f32 -1.442695, %v1673_v57  ;;  %v2213_v12 = vpop.f32.mrb[34].mxu0 }
 0x4c3   :  { %v1761_v43 = vadd.f32 1.0, %v2396_v8  ;;  %2409 = vpow2.f32 %v1959_v7  ;;  %v1688_v17 = vadd.f32 %v2213_v12, %v3227_v11  ;;  %v1682_v60 = vpop.f32.mrb[35].mxu0 }
 0x4c4   :  { %2411 = vrcp.f32 %v1762_v2  ;;  %v1683_v15 = vadd.f32 %v3227_v11, %v1682_v60 }
 0x4c5   :  { %v2398_v44 = vpop.eup %2397  ;;  %2413 = vrcp.f32 %v1761_v43  ;;  %v1961_v33 = vmul.f32 -1.442695, %v1688_v17 }
 0x4c6   :  { %v2400_v16 = vpop.eup %2399  ;;  %v1764_v54 = vadd.f32 1.0, %v2398_v44  ;;  %2415 = vpow2.f32 %v1958_v6  ;;  %v1960_v29 = vmul.f32 -1.442695, %v1683_v15  ;;  %v2216_v18 = vpop.f32.mrb[36].mxu0 }
 0x4c7   :  { %v2402_v24 = vpop.eup %2401  ;;  %1808 = vst [vmem:[#allocation2 + $0x8] sm:$0xff] %v2400_v16  ;;  %2417 = vpow2.f32 %v1961_v33  ;;  %v1698_v39 = vadd.f32 %v2216_v18, %v3227_v11  ;;  %v1692_v30 = vpop.f32.mrb[37].mxu0 }
 0x4c8   :  { %v2404_v19 = vpop.eup %2403  ;;  %1807 = vst [vmem:[#allocation2] sm:$0xff] %v2402_v24  ;;  %2419 = vrcp.f32 %v1764_v54  ;;  %v1693_v42 = vadd.f32 %v3227_v11, %v1692_v30 }
 0x4c9   :  { %v2406_v20 = vpop.eup %2405  ;;  %v1763_v23 = vadd.f32 1.0, %v2404_v19  ;;  %2421 = vpow2.f32 %v1960_v29  ;;  %v1963_v3 = vmul.f32 -1.442695, %v1698_v39 }
 0x4ca   :  { %v2408_v34 = vpop.eup %2407  ;;  %v1766_v27 = vadd.f32 1.0, %v2406_v20  ;;  %v2219_v31 = vpop.f32.mrb[38].mxu0  ;;  %v1962_v48 = vmul.f32 -1.442695, %v1693_v42 }
 0x4cb   :  { %2423 = vrcp.f32 %v1763_v23  ;;  %v1765_v21 = vadd.f32 1.0, %v2408_v34  ;;  %v1708_v32 = vadd.f32 %v2219_v31, %v3227_v11  ;;  %v1702_v10 = vpop.f32.mrb[39].mxu0 }
 0x4cc   :  { %2425 = vrcp.f32 %v1766_v27  ;;  %v1703_v1 = vadd.f32 %v3227_v11, %v1702_v10 }
 0x4cd   :  { %v2410_v22 = vpop.eup %2409  ;;  %2427 = vrcp.f32 %v1765_v21  ;;  %v1965_v26 = vmul.f32 -1.442695, %v1708_v32 }
 0x4ce   :  { %v2412_v37 = vpop.eup %2411  ;;  %v1768_v38 = vadd.f32 1.0, %v2410_v22  ;;  %2429 = vpow2.f32 %v1963_v3  ;;  %v1964_v35 = vmul.f32 -1.442695, %v1703_v1 }
 0x4cf   :  { %v2414_v40 = vpop.eup %2413  ;;  %1810 = vst [vmem:[#allocation2 + $0x18] sm:$0xff] %v2412_v37  ;;  %2431 = vpow2.f32 %v1962_v48 }
 0x4d0   :  { %v2416_v41 = vpop.eup %2415  ;;  %1809 = vst [vmem:[#allocation2 + $0x10] sm:$0xff] %v2414_v40  ;;  %2433 = vrcp.f32 %v1768_v38 }
 0x4d1   :  { %v2418_v36 = vpop.eup %2417  ;;  %v1767_v28 = vadd.f32 1.0, %v2416_v41  ;;  %2435 = vpow2.f32 %v1965_v26 }
 0x4d2   :  { %v2420_v58 = vpop.eup %2419  ;;  %v1770_v47 = vadd.f32 1.0, %v2418_v36  ;;  %2437 = vpow2.f32 %v1964_v35 }
 0x4d3   :  { %v2422_v11 = vpop.eup %2421  ;;  %1812 = vst [vmem:[#allocation2 + $0x28] sm:$0xff] %v2420_v58  ;;  %2439 = vrcp.f32 %v1767_v28 }
 0x4d4   :  { %2441 = vrcp.f32 %v1770_v47  ;;  %v1769_v51 = vadd.f32 1.0, %v2422_v11 }
 0x4d5   :  { %v2424_v49 = vpop.eup %2423 }
 0x4d6   :  { %v2426_v52 = vpop.eup %2425  ;;  %1811 = vst [vmem:[#allocation2 + $0x20] sm:$0xff] %v2424_v49  ;;  %2443 = vrcp.f32 %v1769_v51 }
 0x4d7   :  { %v2428_v55 = vpop.eup %2427  ;;  %1814 = vst [vmem:[#allocation2 + $0x38] sm:$0xff] %v2426_v52 }
 0x4d8   :  { %v2430_v56 = vpop.eup %2429  ;;  %1813 = vst [vmem:[#allocation2 + $0x30] sm:$0xff] %v2428_v55 }
 0x4d9   :  { %v2432_v61 = vpop.eup %2431  ;;  %v1772_v50 = vadd.f32 1.0, %v2430_v56 }
 0x4da   :  { %v2434_v46 = vpop.eup %2433  ;;  %v1771_v62 = vadd.f32 1.0, %v2432_v61 }
 0x4db   :  { %v2436_v45 = vpop.eup %2435  ;;  %1816 = vst [vmem:[#allocation2 + $0x48] sm:$0xff] %v2434_v46  ;;  %2445 = vrcp.f32 %v1772_v50 }
 0x4dc   :  { %v2438_v25 = vpop.eup %2437  ;;  %2447 = vrcp.f32 %v1771_v62  ;;  %v1774_v13 = vadd.f32 1.0, %v2436_v45 }
 0x4dd   :  { %v2440_v5 = vpop.eup %2439  ;;  %v1773_v59 = vadd.f32 1.0, %v2438_v25 }
 0x4de   :  { %v2442_v0 = vpop.eup %2441  ;;  %1815 = vst [vmem:[#allocation2 + $0x40] sm:$0xff] %v2440_v5  ;;  %2449 = vrcp.f32 %v1774_v13 }
 0x4df   :  { %1818 = vst [vmem:[#allocation2 + $0x58] sm:$0xff] %v2442_v0  ;;  %2451 = vrcp.f32 %v1773_v59 }
 0x4e0   :  { %v2444_v63 = vpop.eup %2443 }
 0x4e1   :  { %1817 = vst [vmem:[#allocation2 + $0x50] sm:$0xff] %v2444_v63 }
 0x4e5   :  { %v2446_v53 = vpop.eup %2445 }
 0x4e6   :  { %v2448_v14 = vpop.eup %2447  ;;  %1820 = vst [vmem:[#allocation2 + $0x68] sm:$0xff] %v2446_v53 }
 0x4e7   :  { %1819 = vst [vmem:[#allocation2 + $0x60] sm:$0xff] %v2448_v14 }
 0x4e8   :  { %v2450_v9 = vpop.eup %2449 }
 0x4e9   :  { %v2452_v57 = vpop.eup %2451  ;;  %1822 = vst [vmem:[#allocation2 + $0x78] sm:$0xff] %v2450_v9 }
 0x4ea   :  { %1821 = vst [vmem:[#allocation2 + $0x70] sm:$0xff] %v2452_v57 }
 0x4eb   :  { %2464 = shalt.err (!%p2461_p4)
}
 0x4ec   :  { %s2465_s19 = scalar_lea.hbm %s3265_s8, 2048 }
 0x4ed   :  { %p2466_p5 = scmp.ne.s32.totalorder %s3265_s8, %s2465_s19  ;;  %p2469_p6 = scmp.lt.u32.totalorder %s2465_s19, %s3265_s8 }
 0x4ef   :  { %p2471_p7 = pnand %p2469_p6, %p2466_p5 }
 0x4f1   :  { %2474 = shalt.err (!%p2471_p7)
}
 0x4f2   :  { %s2478_s24 = smov 128   ;;  %s2479_s0 = smov 8  }
 0x4f3   :  { %1834 = dma.vmem_to_hbm [thread:$0]  %s1829_s7, 2048, %s3265_s8, [#allocation3], %s2478_s24, %s2478_s24, %s2479_s0  }
 0x4f4   :  { %2475 = dma.done.wait [#allocation3], 2048  }
 0x4f5   :  { %2476 = vsyncadd [#allocation3], 4294965248 }
 0x4f6   :  { %1838 = vsyncpa [#allocation3], 1 }

</bundles_post_ra>
